<compile_context>
chip_gen: v6e
topology: v6e:2x2x1
jax: 0.10.0
libtpu: 0.0.40
codegen_flags: <defaults>
</compile_context>

<pallas_src>
import jax
import jax.numpy as jnp
from jax import lax
from jax.experimental import pallas as pl
from jax.experimental.pallas import tpu as pltpu  # noqa: F401  (TPU backend assumed)

# ----------------------------- small BERT config -----------------------------
VOCAB = 128
TYPE_VOCAB = 2
MAX_POS = 16
HIDDEN = 32
HEADS = 4
HEAD_DIM = HIDDEN // HEADS
INTER = 64
LAYERS = 2
LN_EPS = 1e-12

# lane offsets inside the packed per-layer weight slab wpack[l] : (HIDDEN, 192)
_QKV_OFF = 0                      # [:, 0:96]   -> Wq|Wk|Wv
_WO_OFF = 3 * HIDDEN              # [:, 96:128] -> Wo (attention output dense)
_WI_OFF = 4 * HIDDEN              # [:, 128:192]-> Wi (FFN intermediate dense)
_WPACK_COLS = 4 * HIDDEN + INTER  # 192

# row assignment inside the per-layer f32 bias/LN slab layer_vec[l] : (8, 128)
_R_BQKV, _R_BO, _R_LN1G, _R_LN1B, _R_BI, _R_BO2, _R_LN2G, _R_LN2B = range(8)
# row assignment inside the misc f32 slab : (4, HIDDEN)
_R_EMBG, _R_EMBB, _R_POOLB = 0, 1, 2


# ------------------------------ fused Pallas kernel ---------------------------
def _bert_kernel(ids_ref, mask_ref, word_ref, pos_type_ref, misc_ref,
                 layer_vec_ref, wpack_ref, wo2_ref, pool_w_ref,
                 hidden_ref, pooled_ref):
    """Full BERT forward in one program: one-hot embedding gather -> embedding LN ->
    LAYERS encoder layers (fused QKV, batch-batched per-head attention, concat-free
    output projection, residual+LN, GELU FFN, residual+LN) -> pooler (tanh on CLS)."""
    f32 = jnp.float32
    bf16 = jnp.bfloat16

    M = ids_ref.shape[0]                 # B * S tokens, folded into the sublane dim
    B, _, S = mask_ref.shape
    H = HIDDEN
    scale = f32(1.0 / (HEAD_DIM ** 0.5))

    def ln(x, g, b):
        mean = jnp.mean(x, axis=-1, keepdims=True)
        var = jnp.mean(jnp.square(x - mean), axis=-1, keepdims=True)
        return (x - mean) * lax.rsqrt(var + f32(LN_EPS)) * g + b

    def mmul(x, w_bf16):
        # bf16 operands on the MXU, f32 accumulation; elementwise math stays f32.
        return jnp.dot(x.astype(bf16), w_bf16, preferred_element_type=f32)

    misc = misc_ref[...]                                   # (4, H) f32
    emb_g = misc[_R_EMBG:_R_EMBG + 1, :]
    emb_b = misc[_R_EMBB:_R_EMBB + 1, :]
    pool_b = misc[_R_POOLB:_R_POOLB + 1, :]

    # ---- in-kernel embedding gather: one-hot(ids) @ word_table on the MXU ----
    ids = ids_ref[...]                                                   # (M, 1) int32
    vocab_iota = lax.broadcasted_iota(jnp.int32, (M, VOCAB), 1)          # (M, VOCAB)
    one_hot = (ids == vocab_iota).astype(f32)
    x = jnp.dot(one_hot, word_ref[...], preferred_element_type=f32)      # (M, H)

    # position (+ folded type-0) embeddings, tiled across the batch
    pos = pos_type_ref[0:S, :]                                           # (S, H)
    x = x + jnp.broadcast_to(pos[None, :, :], (B, S, H)).reshape(M, H)
    x = ln(x, emb_g, emb_b)

    # ---- additive attention mask, HF convention: 1 -> 0, 0 -> -10000 ----
    add_mask = (1.0 - mask_ref[...].astype(f32)) * f32(-10000.0)         # (B, 1, S)

    for l in range(LAYERS):              # unrolled: weights stay VMEM-resident
        lv = layer_vec_ref[l]                                            # (8, 128) f32
        bqkv = lv[_R_BQKV:_R_BQKV + 1, 0:3 * H]
        bo = lv[_R_BO:_R_BO + 1, 0:H]
        ln1g = lv[_R_LN1G:_R_LN1G + 1, 0:H]
        ln1b = lv[_R_LN1B:_R_LN1B + 1, 0:H]
        bi = lv[_R_BI:_R_BI + 1, 0:INTER]
        bo2 = lv[_R_BO2:_R_BO2 + 1, 0:H]
        ln2g = lv[_R_LN2G:_R_LN2G + 1, 0:H]
        ln2b = lv[_R_LN2B:_R_LN2B + 1, 0:H]

        # ---- self-attention: fused QKV matmul over the whole (B*S) slab ----
        wqkv = wpack_ref[l, :, _QKV_OFF:_QKV_OFF + 3 * H]                # (H, 3H) bf16
        qkv = mmul(x, wqkv) + bqkv                                       # (M, 3H) f32
        q = qkv[:, 0:H].reshape(B, S, H)
        k = qkv[:, H:2 * H].reshape(B, S, H)
        v = qkv[:, 2 * H:3 * H].reshape(B, S, H)

        # per-head static lane slices, einsums batched over the batch dim; the
        # output projection is a concat-free sum of per-head partial matmuls.
        attn = None
        for h in range(HEADS):
            sl = slice(h * HEAD_DIM, (h + 1) * HEAD_DIM)
            s = jnp.einsum("bqd,bkd->bqk", q[:, :, sl], k[:, :, sl],
                           preferred_element_type=f32) * scale + add_mask   # (B,S,S)
            s = s - jnp.max(s, axis=-1, keepdims=True)
            p = jnp.exp(s)
            p = p * pl.reciprocal(jnp.sum(p, axis=-1, keepdims=True), approx=True)
            ctx = jnp.einsum("bqk,bkd->bqd", p, v[:, :, sl],
                             preferred_element_type=f32)                    # (B,S,D)
            wo_h = wpack_ref[l, h * HEAD_DIM:(h + 1) * HEAD_DIM,
                             _WO_OFF:_WO_OFF + H]                           # (D,H) bf16
            part = mmul(ctx.reshape(M, HEAD_DIM), wo_h)                     # (M,H)
            attn = part if attn is None else attn + part
        x = ln(attn + bo + x, ln1g, ln1b)

        # ---- feed-forward (exact-erf GELU, matches HF hidden_act="gelu") ----
        wi = wpack_ref[l, :, _WI_OFF:_WI_OFF + INTER]                    # (H, INTER) bf16
        inter = mmul(x, wi) + bi                                         # (M, INTER) f32
        inter = 0.5 * inter * (1.0 + lax.erf(inter * f32(0.7071067811865476)))
        ffn = mmul(inter, wo2_ref[l]) + bo2                              # (M, H)
        x = ln(ffn + x, ln2g, ln2b)

    hidden_ref[...] = x.astype(hidden_ref.dtype)                         # (M, H)

    # ---- pooler: dense + tanh on the [CLS] token of each sequence ----
    for b in range(B):
        cls = x[b * S:b * S + 1, :]                                      # (1, H)
        pooled = jnp.tanh(mmul(cls, pool_w_ref[...]) + pool_b)
        pooled_ref[pl.ds(b, 1), :] = pooled.astype(pooled_ref.dtype)


# --------------------------------- wrapper ------------------------------------
def bert_forward(packed, input_ids, attention_mask):
    B, S = input_ids.shape
    M = B * S
    # Only free reshapes here; all per-token compute (gather, mask, embeddings,
    # encoder layers, pooler) happens inside the single pallas_call.
    ids = input_ids.reshape(M, 1).astype(jnp.int32)
    mask = attention_mask.reshape(B, 1, S).astype(jnp.int32)

    hidden_flat, pooled = pl.pallas_call(
        _bert_kernel,
        out_shape=(
            jax.ShapeDtypeStruct((M, HIDDEN), jnp.float32),
            jax.ShapeDtypeStruct((B, HIDDEN), jnp.float32),
        ),
    )(ids, mask,
      packed["word_emb"], packed["pos_type"], packed["misc"],
      packed["layer_vec"], packed["wpack"], packed["wo2"], packed["pool_w"])

    # mimic BertModel output: (last_hidden_state, pooler_output)
    return hidden_flat.reshape(B, S, HIDDEN), pooled


bert_forward_jit = jax.jit(bert_forward)


# ------------------------------ parameter init --------------------------------
def init_params(key):
    """Deterministic synthetic parameters with BertModel-like structure."""
    def nrm(k, shape):
        return 0.02 * jax.random.normal(k, shape, dtype=jnp.float32)

    k_word, k_pos, k_type, k_pool, k_layers = jax.random.split(key, 5)
    raw = {
        "word_emb": nrm(k_word, (VOCAB, HIDDEN)),
        "pos_emb": nrm(k_pos, (MAX_POS, HIDDEN)),
        "type_emb": nrm(k_type, (TYPE_VOCAB, HIDDEN)),
        "emb_ln_g": jnp.ones((HIDDEN,), jnp.float32),
        "emb_ln_b": jnp.zeros((HIDDEN,), jnp.float32),
        "pool_w": nrm(k_pool, (HIDDEN, HIDDEN)),
        "pool_b": jnp.zeros((HIDDEN,), jnp.float32),
        "layers": [],
    }
    zH = jnp.zeros((HIDDEN,), jnp.float32)
    oH = jnp.ones((HIDDEN,), jnp.float32)
    for l in range(LAYERS):
        lk = jax.random.split(jax.random.fold_in(k_layers, l), 6)
        raw["layers"].append({
            "wq": nrm(lk[0], (HIDDEN, HIDDEN)), "bq": zH,
            "wk": nrm(lk[1], (HIDDEN, HIDDEN)), "bk": zH,
            "wv": nrm(lk[2], (HIDDEN, HIDDEN)), "bv": zH,
            "wo": nrm(lk[3], (HIDDEN, HIDDEN)), "bo": zH,
            "ln1_g": oH, "ln1_b": zH,
            "wi": nrm(lk[4], (HIDDEN, INTER)), "bi": jnp.zeros((INTER,), jnp.float32),
            "wo2": nrm(lk[5], (INTER, HIDDEN)), "bo2": zH,
            "ln2_g": oH, "ln2_b": zH,
        })
    return raw


def pack_params(raw):
    """Pack raw BERT params into the kernel's slab layout (done once, outside jit)."""
    f32, bf16 = jnp.float32, jnp.bfloat16
    wpack, wo2, layer_vec = [], [], []
    for lp in raw["layers"]:
        wqkv = jnp.concatenate([lp["wq"], lp["wk"], lp["wv"]], axis=1)      # (H, 3H)
        wpack.append(jnp.concatenate([wqkv, lp["wo"], lp["wi"]], axis=1))   # (H, 192)
        wo2.append(lp["wo2"])                                               # (INTER, H)

        rows = jnp.zeros((8, 128), f32)
        rows = rows.at[_R_BQKV, 0:3 * HIDDEN].set(
            jnp.concatenate([lp["bq"], lp["bk"], lp["bv"]]))
        rows = rows.at[_R_BO, 0:HIDDEN].set(lp["bo"])
        rows = rows.at[_R_LN1G, 0:HIDDEN].set(lp["ln1_g"])
        rows = rows.at[_R_LN1B, 0:HIDDEN].set(lp["ln1_b"])
        rows = rows.at[_R_BI, 0:INTER].set(lp["bi"])
        rows = rows.at[_R_BO2, 0:HIDDEN].set(lp["bo2"])
        rows = rows.at[_R_LN2G, 0:HIDDEN].set(lp["ln2_g"])
        rows = rows.at[_R_LN2B, 0:HIDDEN].set(lp["ln2_b"])
        layer_vec.append(rows)

    misc = jnp.zeros((4, HIDDEN), f32)
    misc = misc.at[_R_EMBG].set(raw["emb_ln_g"])
    misc = misc.at[_R_EMBB].set(raw["emb_ln_b"])
    misc = misc.at[_R_POOLB].set(raw["pool_b"])

    return {
        "word_emb": raw["word_emb"].astype(f32),                            # (VOCAB, H)
        # token_type_ids are all zeros for forward(input_ids, attention_mask),
        # so type row 0 is folded into the position table at pack time.
        "pos_type": (raw["pos_emb"] + raw["type_emb"][0][None, :]).astype(f32),
        "misc": misc,                                                        # (4, H) f32
        "layer_vec": jnp.stack(layer_vec),                                   # (L, 8, 128) f32
        "wpack": jnp.stack(wpack).astype(bf16),                              # (L, H, 192) bf16
        "wo2": jnp.stack(wo2).astype(bf16),                                  # (L, INTER, H) bf16
        "pool_w": raw["pool_w"].astype(bf16),                                # (H, H) bf16
    }


# ------------------------------------ main -------------------------------------
if __name__ == "__main__":
    key = jax.random.PRNGKey(0)
    pkey, ikey = jax.random.split(key)

    packed = pack_params(init_params(pkey))

    B, S = 2, 8
    input_ids = jax.random.randint(ikey, (B, S), 0, VOCAB, dtype=jnp.int32)
    attention_mask = jnp.ones((B, S), dtype=jnp.int32)
    attention_mask = attention_mask.at[1, 6:].set(0)   # pad tail of 2nd sequence

    last_hidden, pooled = bert_forward_jit(packed, input_ids, attention_mask)
    jax.block_until_ready((last_hidden, pooled))

    assert last_hidden.shape == (B, S, HIDDEN)
    assert pooled.shape == (B, HIDDEN)
    assert bool(jnp.all(jnp.isfinite(last_hidden))) and bool(jnp.all(jnp.isfinite(pooled)))
    print("KERNEL_OK")
</pallas_src>

<mosaic_0001>
module attributes {stable_mosaic.version = 11 : i64} {
  func.func @_bert_kernel(%arg0: memref<16x1xi32, #tpu.memory_space<vmem>>, %arg1: memref<2x1x8xi32, #tpu.memory_space<vmem>>, %arg2: memref<128x32xf32, #tpu.memory_space<vmem>>, %arg3: memref<16x32xf32, #tpu.memory_space<vmem>>, %arg4: memref<4x32xf32, #tpu.memory_space<vmem>>, %arg5: memref<2x8x128xf32, #tpu.memory_space<vmem>>, %arg6: memref<2x32x192xbf16, #tpu.memory_space<vmem>>, %arg7: memref<2x64x32xbf16, #tpu.memory_space<vmem>>, %arg8: memref<32x32xbf16, #tpu.memory_space<vmem>>, %arg9: memref<16x32xf32, #tpu.memory_space<vmem>>, %arg10: memref<2x32xf32, #tpu.memory_space<vmem>>) attributes {dimension_semantics = [], scalar_prefetch = 0 : i64, scratch_operands = 0 : i64, tpu.core_type = #tpu.core_type<tc>} {
    %c0 = arith.constant 0 : index
    %c0_0 = arith.constant 0 : index
    %0 = vector.load %arg4[%c0, %c0_0] : memref<4x32xf32, #tpu.memory_space<vmem>>, vector<4x32xf32>
    %1 = vector.extract_strided_slice %0 {offsets = [0, 0], sizes = [1, 32], strides = [1, 1]} : vector<4x32xf32> to vector<1x32xf32>
    %2 = vector.extract_strided_slice %0 {offsets = [1, 0], sizes = [1, 32], strides = [1, 1]} : vector<4x32xf32> to vector<1x32xf32>
    %3 = vector.extract_strided_slice %0 {offsets = [2, 0], sizes = [1, 32], strides = [1, 1]} : vector<4x32xf32> to vector<1x32xf32>
    %c0_1 = arith.constant 0 : index
    %c0_2 = arith.constant 0 : index
    %4 = vector.load %arg0[%c0_1, %c0_2] : memref<16x1xi32, #tpu.memory_space<vmem>>, vector<16x1xi32>
    %5 = tpu.iota {dimensions = array<i32: 1>} : vector<16x128xi32>
    %6 = vector.broadcast %4 : vector<16x1xi32> to vector<16x128xi32>
    %7 = arith.cmpi eq, %6, %5 : vector<16x128xi32>
    %8 = arith.extui %7 : vector<16x128xi1> to vector<16x128xi32>
    %9 = arith.sitofp %8 : vector<16x128xi32> to vector<16x128xf32>
    %c0_3 = arith.constant 0 : index
    %c0_4 = arith.constant 0 : index
    %10 = vector.load %arg2[%c0_3, %c0_4] : memref<128x32xf32, #tpu.memory_space<vmem>>, vector<128x32xf32>
    %cst = arith.constant dense<0.000000e+00> : vector<16x32xf32>
    %11 = tpu.matmul %9, %10, %cst {dimension_numbers = #tpu.dot_dimension_numbers<[1], [0], [0], [1], [0, 0, 1, 1], [], []>} : vector<16x128xf32>, vector<128x32xf32>, vector<16x32xf32> -> vector<16x32xf32>
    %c0_5 = arith.constant 0 : index
    %c0_6 = arith.constant 0 : index
    %12 = vector.load %arg3[%c0_5, %c0_6] : memref<16x32xf32, #tpu.memory_space<vmem>>, vector<8x32xf32>
    %13 = vector.shape_cast %12 : vector<8x32xf32> to vector<1x8x32xf32>
    %14 = vector.shape_cast %13 : vector<1x8x32xf32> to vector<1x8x32xf32>
    %15 = vector.broadcast %14 : vector<1x8x32xf32> to vector<2x8x32xf32>
    %16 = vector.shape_cast %15 : vector<2x8x32xf32> to vector<16x32xf32>
    %17 = arith.addf %11, %16 : vector<16x32xf32>
    %cst_7 = arith.constant dense<0.000000e+00> : vector<16xf32>
    %18 = vector.multi_reduction <add>, %17, %cst_7 [1] : vector<16x32xf32> to vector<16xf32>
    %19 = vector.shape_cast %18 : vector<16xf32> to vector<16x1xf32>
    %cst_8 = arith.constant 3.200000e+01 : f32
    %20 = vector.broadcast %cst_8 : f32 to vector<16x1xf32>
    %21 = arith.divf %19, %20 : vector<16x1xf32>
    %22 = vector.broadcast %21 : vector<16x1xf32> to vector<16x32xf32>
    %23 = arith.subf %17, %22 : vector<16x32xf32>
    %24 = arith.mulf %23, %23 : vector<16x32xf32>
    %cst_9 = arith.constant dense<0.000000e+00> : vector<16xf32>
    %25 = vector.multi_reduction <add>, %24, %cst_9 [1] : vector<16x32xf32> to vector<16xf32>
    %26 = vector.shape_cast %25 : vector<16xf32> to vector<16x1xf32>
    %cst_10 = arith.constant 3.200000e+01 : f32
    %27 = vector.broadcast %cst_10 : f32 to vector<16x1xf32>
    %28 = arith.divf %26, %27 : vector<16x1xf32>
    %29 = vector.broadcast %21 : vector<16x1xf32> to vector<16x32xf32>
    %30 = arith.subf %17, %29 : vector<16x32xf32>
    %cst_11 = arith.constant 9.99999996E-13 : f32
    %31 = vector.broadcast %cst_11 : f32 to vector<16x1xf32>
    %32 = arith.addf %28, %31 : vector<16x1xf32>
    %33 = math.rsqrt %32 : vector<16x1xf32>
    %34 = vector.broadcast %33 : vector<16x1xf32> to vector<16x32xf32>
    %35 = arith.mulf %30, %34 : vector<16x32xf32>
    %36 = vector.broadcast %1 : vector<1x32xf32> to vector<16x32xf32>
    %37 = arith.mulf %35, %36 : vector<16x32xf32>
    %38 = vector.broadcast %2 : vector<1x32xf32> to vector<16x32xf32>
    %39 = arith.addf %37, %38 : vector<16x32xf32>
    %c0_12 = arith.constant 0 : index
    %c0_13 = arith.constant 0 : index
    %c0_14 = arith.constant 0 : index
    %40 = vector.load %arg1[%c0_12, %c0_13, %c0_14] : memref<2x1x8xi32, #tpu.memory_space<vmem>>, vector<2x1x8xi32>
    %41 = arith.sitofp %40 : vector<2x1x8xi32> to vector<2x1x8xf32>
    %cst_15 = arith.constant 1.000000e+00 : f32
    %42 = vector.broadcast %cst_15 : f32 to vector<2x1x8xf32>
    %43 = arith.subf %42, %41 : vector<2x1x8xf32>
    %cst_16 = arith.constant -1.000000e+04 : f32
    %44 = vector.broadcast %cst_16 : f32 to vector<2x1x8xf32>
    %45 = arith.mulf %43, %44 : vector<2x1x8xf32>
    %c0_17 = arith.constant 0 : index
    %c0_18 = arith.constant 0 : index
    %c0_19 = arith.constant 0 : index
    %46 = vector.load %arg5[%c0_17, %c0_18, %c0_19] : memref<2x8x128xf32, #tpu.memory_space<vmem>>, vector<1x8x128xf32>
    %47 = vector.shape_cast %46 : vector<1x8x128xf32> to vector<8x128xf32>
    %48 = vector.extract_strided_slice %47 {offsets = [0, 0], sizes = [1, 96], strides = [1, 1]} : vector<8x128xf32> to vector<1x96xf32>
    %49 = vector.extract_strided_slice %47 {offsets = [1, 0], sizes = [1, 32], strides = [1, 1]} : vector<8x128xf32> to vector<1x32xf32>
    %50 = vector.extract_strided_slice %47 {offsets = [2, 0], sizes = [1, 32], strides = [1, 1]} : vector<8x128xf32> to vector<1x32xf32>
    %51 = vector.extract_strided_slice %47 {offsets = [3, 0], sizes = [1, 32], strides = [1, 1]} : vector<8x128xf32> to vector<1x32xf32>
    %52 = vector.extract_strided_slice %47 {offsets = [4, 0], sizes = [1, 64], strides = [1, 1]} : vector<8x128xf32> to vector<1x64xf32>
    %53 = vector.extract_strided_slice %47 {offsets = [5, 0], sizes = [1, 32], strides = [1, 1]} : vector<8x128xf32> to vector<1x32xf32>
    %54 = vector.extract_strided_slice %47 {offsets = [6, 0], sizes = [1, 32], strides = [1, 1]} : vector<8x128xf32> to vector<1x32xf32>
    %55 = vector.extract_strided_slice %47 {offsets = [7, 0], sizes = [1, 32], strides = [1, 1]} : vector<8x128xf32> to vector<1x32xf32>
    %c0_20 = arith.constant 0 : index
    %c0_21 = arith.constant 0 : index
    %c0_22 = arith.constant 0 : index
    %56 = vector.load %arg6[%c0_20, %c0_21, %c0_22] : memref<2x32x192xbf16, #tpu.memory_space<vmem>>, vector<1x32x96xbf16>
    %57 = vector.shape_cast %56 : vector<1x32x96xbf16> to vector<32x96xbf16>
    %58 = arith.truncf %39 : vector<16x32xf32> to vector<16x32xbf16>
    %cst_23 = arith.constant dense<0.000000e+00> : vector<16x96xf32>
    %59 = tpu.matmul %58, %57, %cst_23 {dimension_numbers = #tpu.dot_dimension_numbers<[1], [0], [0], [1], [0, 0, 1, 1], [], []>} : vector<16x32xbf16>, vector<32x96xbf16>, vector<16x96xf32> -> vector<16x96xf32>
    %60 = vector.broadcast %48 : vector<1x96xf32> to vector<16x96xf32>
    %61 = arith.addf %59, %60 : vector<16x96xf32>
    %62 = vector.extract_strided_slice %61 {offsets = [0, 0], sizes = [16, 32], strides = [1, 1]} : vector<16x96xf32> to vector<16x32xf32>
    %63 = vector.shape_cast %62 : vector<16x32xf32> to vector<2x8x32xf32>
    %64 = vector.extract_strided_slice %61 {offsets = [0, 32], sizes = [16, 32], strides = [1, 1]} : vector<16x96xf32> to vector<16x32xf32>
    %65 = vector.shape_cast %64 : vector<16x32xf32> to vector<2x8x32xf32>
    %66 = vector.extract_strided_slice %61 {offsets = [0, 64], sizes = [16, 32], strides = [1, 1]} : vector<16x96xf32> to vector<16x32xf32>
    %67 = vector.shape_cast %66 : vector<16x32xf32> to vector<2x8x32xf32>
    %68 = vector.extract_strided_slice %63 {offsets = [0, 0, 0], sizes = [2, 8, 8], strides = [1, 1, 1]} : vector<2x8x32xf32> to vector<2x8x8xf32>
    %69 = vector.extract_strided_slice %65 {offsets = [0, 0, 0], sizes = [2, 8, 8], strides = [1, 1, 1]} : vector<2x8x32xf32> to vector<2x8x8xf32>
    "tpu.trace_start"() <{level = 10 : i32, message = "bqd,bkd->bqk"}> : () -> ()
    %cst_24 = arith.constant dense<0.000000e+00> : vector<2x8x8xf32>
    %70 = tpu.matmul %68, %69, %cst_24 {dimension_numbers = #tpu.dot_dimension_numbers<[2], [2], [1], [1], [0, 0, 0, 1, 1, 1], [0], [0]>} : vector<2x8x8xf32>, vector<2x8x8xf32>, vector<2x8x8xf32> -> vector<2x8x8xf32>
    "tpu.trace_stop"() : () -> ()
    %cst_25 = arith.constant 0.353553385 : f32
    %71 = vector.broadcast %cst_25 : f32 to vector<2x8x8xf32>
    %72 = arith.mulf %70, %71 : vector<2x8x8xf32>
    %73 = vector.broadcast %45 : vector<2x1x8xf32> to vector<2x8x8xf32>
    %74 = arith.addf %72, %73 : vector<2x8x8xf32>
    %cst_26 = arith.constant dense<0xFF800000> : vector<2x8xf32>
    %75 = vector.multi_reduction <maximumf>, %74, %cst_26 [2] : vector<2x8x8xf32> to vector<2x8xf32>
    %76 = vector.shape_cast %75 : vector<2x8xf32> to vector<2x8x1xf32>
    %77 = vector.broadcast %76 : vector<2x8x1xf32> to vector<2x8x8xf32>
    %78 = arith.subf %74, %77 : vector<2x8x8xf32>
    %79 = math.exp %78 : vector<2x8x8xf32>
    %cst_27 = arith.constant dense<0.000000e+00> : vector<2x8xf32>
    %80 = vector.multi_reduction <add>, %79, %cst_27 [2] : vector<2x8x8xf32> to vector<2x8xf32>
    %81 = vector.shape_cast %80 : vector<2x8xf32> to vector<2x8x1xf32>
    %82 = tpu.reciprocal %81 {approx = true} : vector<2x8x1xf32> -> vector<2x8x1xf32>
    %83 = vector.broadcast %82 : vector<2x8x1xf32> to vector<2x8x8xf32>
    %84 = arith.mulf %79, %83 : vector<2x8x8xf32>
    %85 = vector.extract_strided_slice %67 {offsets = [0, 0, 0], sizes = [2, 8, 8], strides = [1, 1, 1]} : vector<2x8x32xf32> to vector<2x8x8xf32>
    "tpu.trace_start"() <{level = 10 : i32, message = "bqk,bkd->bqd"}> : () -> ()
    %cst_28 = arith.constant dense<0.000000e+00> : vector<2x8x8xf32>
    %86 = tpu.matmul %84, %85, %cst_28 {dimension_numbers = #tpu.dot_dimension_numbers<[2], [1], [1], [2], [0, 0, 0, 1, 1, 2], [0], [0]>} : vector<2x8x8xf32>, vector<2x8x8xf32>, vector<2x8x8xf32> -> vector<2x8x8xf32>
    "tpu.trace_stop"() : () -> ()
    %c0_29 = arith.constant 0 : index
    %c0_30 = arith.constant 0 : index
    %c96 = arith.constant 96 : index
    %87 = vector.load %arg6[%c0_29, %c0_30, %c96] : memref<2x32x192xbf16, #tpu.memory_space<vmem>>, vector<1x8x32xbf16>
    %88 = vector.shape_cast %87 : vector<1x8x32xbf16> to vector<8x32xbf16>
    %89 = vector.shape_cast %86 : vector<2x8x8xf32> to vector<16x8xf32>
    %90 = arith.truncf %89 : vector<16x8xf32> to vector<16x8xbf16>
    %cst_31 = arith.constant dense<0.000000e+00> : vector<16x32xf32>
    %91 = tpu.matmul %90, %88, %cst_31 {dimension_numbers = #tpu.dot_dimension_numbers<[1], [0], [0], [1], [0, 0, 1, 1], [], []>} : vector<16x8xbf16>, vector<8x32xbf16>, vector<16x32xf32> -> vector<16x32xf32>
    %92 = vector.extract_strided_slice %63 {offsets = [0, 0, 8], sizes = [2, 8, 8], strides = [1, 1, 1]} : vector<2x8x32xf32> to vector<2x8x8xf32>
    %93 = vector.extract_strided_slice %65 {offsets = [0, 0, 8], sizes = [2, 8, 8], strides = [1, 1, 1]} : vector<2x8x32xf32> to vector<2x8x8xf32>
    "tpu.trace_start"() <{level = 10 : i32, message = "bqd,bkd->bqk"}> : () -> ()
    %cst_32 = arith.constant dense<0.000000e+00> : vector<2x8x8xf32>
    %94 = tpu.matmul %92, %93, %cst_32 {dimension_numbers = #tpu.dot_dimension_numbers<[2], [2], [1], [1], [0, 0, 0, 1, 1, 1], [0], [0]>} : vector<2x8x8xf32>, vector<2x8x8xf32>, vector<2x8x8xf32> -> vector<2x8x8xf32>
    "tpu.trace_stop"() : () -> ()
    %cst_33 = arith.constant 0.353553385 : f32
    %95 = vector.broadcast %cst_33 : f32 to vector<2x8x8xf32>
    %96 = arith.mulf %94, %95 : vector<2x8x8xf32>
    %97 = vector.broadcast %45 : vector<2x1x8xf32> to vector<2x8x8xf32>
    %98 = arith.addf %96, %97 : vector<2x8x8xf32>
    %cst_34 = arith.constant dense<0xFF800000> : vector<2x8xf32>
    %99 = vector.multi_reduction <maximumf>, %98, %cst_34 [2] : vector<2x8x8xf32> to vector<2x8xf32>
    %100 = vector.shape_cast %99 : vector<2x8xf32> to vector<2x8x1xf32>
    %101 = vector.broadcast %100 : vector<2x8x1xf32> to vector<2x8x8xf32>
    %102 = arith.subf %98, %101 : vector<2x8x8xf32>
    %103 = math.exp %102 : vector<2x8x8xf32>
    %cst_35 = arith.constant dense<0.000000e+00> : vector<2x8xf32>
    %104 = vector.multi_reduction <add>, %103, %cst_35 [2] : vector<2x8x8xf32> to vector<2x8xf32>
    %105 = vector.shape_cast %104 : vector<2x8xf32> to vector<2x8x1xf32>
    %106 = tpu.reciprocal %105 {approx = true} : vector<2x8x1xf32> -> vector<2x8x1xf32>
    %107 = vector.broadcast %106 : vector<2x8x1xf32> to vector<2x8x8xf32>
    %108 = arith.mulf %103, %107 : vector<2x8x8xf32>
    %109 = vector.extract_strided_slice %67 {offsets = [0, 0, 8], sizes = [2, 8, 8], strides = [1, 1, 1]} : vector<2x8x32xf32> to vector<2x8x8xf32>
    "tpu.trace_start"() <{level = 10 : i32, message = "bqk,bkd->bqd"}> : () -> ()
    %cst_36 = arith.constant dense<0.000000e+00> : vector<2x8x8xf32>
    %110 = tpu.matmul %108, %109, %cst_36 {dimension_numbers = #tpu.dot_dimension_numbers<[2], [1], [1], [2], [0, 0, 0, 1, 1, 2], [0], [0]>} : vector<2x8x8xf32>, vector<2x8x8xf32>, vector<2x8x8xf32> -> vector<2x8x8xf32>
    "tpu.trace_stop"() : () -> ()
    %c0_37 = arith.constant 0 : index
    %c8 = arith.constant 8 : index
    %c96_38 = arith.constant 96 : index
    %111 = vector.load %arg6[%c0_37, %c8, %c96_38] : memref<2x32x192xbf16, #tpu.memory_space<vmem>>, vector<1x8x32xbf16>
    %112 = vector.shape_cast %111 : vector<1x8x32xbf16> to vector<8x32xbf16>
    %113 = vector.shape_cast %110 : vector<2x8x8xf32> to vector<16x8xf32>
    %114 = arith.truncf %113 : vector<16x8xf32> to vector<16x8xbf16>
    %cst_39 = arith.constant dense<0.000000e+00> : vector<16x32xf32>
    %115 = tpu.matmul %114, %112, %cst_39 {dimension_numbers = #tpu.dot_dimension_numbers<[1], [0], [0], [1], [0, 0, 1, 1], [], []>} : vector<16x8xbf16>, vector<8x32xbf16>, vector<16x32xf32> -> vector<16x32xf32>
    %116 = arith.addf %91, %115 : vector<16x32xf32>
    %117 = vector.extract_strided_slice %63 {offsets = [0, 0, 16], sizes = [2, 8, 8], strides = [1, 1, 1]} : vector<2x8x32xf32> to vector<2x8x8xf32>
    %118 = vector.extract_strided_slice %65 {offsets = [0, 0, 16], sizes = [2, 8, 8], strides = [1, 1, 1]} : vector<2x8x32xf32> to vector<2x8x8xf32>
    "tpu.trace_start"() <{level = 10 : i32, message = "bqd,bkd->bqk"}> : () -> ()
    %cst_40 = arith.constant dense<0.000000e+00> : vector<2x8x8xf32>
    %119 = tpu.matmul %117, %118, %cst_40 {dimension_numbers = #tpu.dot_dimension_numbers<[2], [2], [1], [1], [0, 0, 0, 1, 1, 1], [0], [0]>} : vector<2x8x8xf32>, vector<2x8x8xf32>, vector<2x8x8xf32> -> vector<2x8x8xf32>
    "tpu.trace_stop"() : () -> ()
    %cst_41 = arith.constant 0.353553385 : f32
    %120 = vector.broadcast %cst_41 : f32 to vector<2x8x8xf32>
    %121 = arith.mulf %119, %120 : vector<2x8x8xf32>
    %122 = vector.broadcast %45 : vector<2x1x8xf32> to vector<2x8x8xf32>
    %123 = arith.addf %121, %122 : vector<2x8x8xf32>
    %cst_42 = arith.constant dense<0xFF800000> : vector<2x8xf32>
    %124 = vector.multi_reduction <maximumf>, %123, %cst_42 [2] : vector<2x8x8xf32> to vector<2x8xf32>
    %125 = vector.shape_cast %124 : vector<2x8xf32> to vector<2x8x1xf32>
    %126 = vector.broadcast %125 : vector<2x8x1xf32> to vector<2x8x8xf32>
    %127 = arith.subf %123, %126 : vector<2x8x8xf32>
    %128 = math.exp %127 : vector<2x8x8xf32>
    %cst_43 = arith.constant dense<0.000000e+00> : vector<2x8xf32>
    %129 = vector.multi_reduction <add>, %128, %cst_43 [2] : vector<2x8x8xf32> to vector<2x8xf32>
    %130 = vector.shape_cast %129 : vector<2x8xf32> to vector<2x8x1xf32>
    %131 = tpu.reciprocal %130 {approx = true} : vector<2x8x1xf32> -> vector<2x8x1xf32>
    %132 = vector.broadcast %131 : vector<2x8x1xf32> to vector<2x8x8xf32>
    %133 = arith.mulf %128, %132 : vector<2x8x8xf32>
    %134 = vector.extract_strided_slice %67 {offsets = [0, 0, 16], sizes = [2, 8, 8], strides = [1, 1, 1]} : vector<2x8x32xf32> to vector<2x8x8xf32>
    "tpu.trace_start"() <{level = 10 : i32, message = "bqk,bkd->bqd"}> : () -> ()
    %cst_44 = arith.constant dense<0.000000e+00> : vector<2x8x8xf32>
    %135 = tpu.matmul %133, %134, %cst_44 {dimension_numbers = #tpu.dot_dimension_numbers<[2], [1], [1], [2], [0, 0, 0, 1, 1, 2], [0], [0]>} : vector<2x8x8xf32>, vector<2x8x8xf32>, vector<2x8x8xf32> -> vector<2x8x8xf32>
    "tpu.trace_stop"() : () -> ()
    %c0_45 = arith.constant 0 : index
    %c16 = arith.constant 16 : index
    %c96_46 = arith.constant 96 : index
    %136 = vector.load %arg6[%c0_45, %c16, %c96_46] : memref<2x32x192xbf16, #tpu.memory_space<vmem>>, vector<1x8x32xbf16>
    %137 = vector.shape_cast %136 : vector<1x8x32xbf16> to vector<8x32xbf16>
    %138 = vector.shape_cast %135 : vector<2x8x8xf32> to vector<16x8xf32>
    %139 = arith.truncf %138 : vector<16x8xf32> to vector<16x8xbf16>
    %cst_47 = arith.constant dense<0.000000e+00> : vector<16x32xf32>
    %140 = tpu.matmul %139, %137, %cst_47 {dimension_numbers = #tpu.dot_dimension_numbers<[1], [0], [0], [1], [0, 0, 1, 1], [], []>} : vector<16x8xbf16>, vector<8x32xbf16>, vector<16x32xf32> -> vector<16x32xf32>
    %141 = arith.addf %116, %140 : vector<16x32xf32>
    %142 = vector.extract_strided_slice %63 {offsets = [0, 0, 24], sizes = [2, 8, 8], strides = [1, 1, 1]} : vector<2x8x32xf32> to vector<2x8x8xf32>
    %143 = vector.extract_strided_slice %65 {offsets = [0, 0, 24], sizes = [2, 8, 8], strides = [1, 1, 1]} : vector<2x8x32xf32> to vector<2x8x8xf32>
    "tpu.trace_start"() <{level = 10 : i32, message = "bqd,bkd->bqk"}> : () -> ()
    %cst_48 = arith.constant dense<0.000000e+00> : vector<2x8x8xf32>
    %144 = tpu.matmul %142, %143, %cst_48 {dimension_numbers = #tpu.dot_dimension_numbers<[2], [2], [1], [1], [0, 0, 0, 1, 1, 1], [0], [0]>} : vector<2x8x8xf32>, vector<2x8x8xf32>, vector<2x8x8xf32> -> vector<2x8x8xf32>
    "tpu.trace_stop"() : () -> ()
    %cst_49 = arith.constant 0.353553385 : f32
    %145 = vector.broadcast %cst_49 : f32 to vector<2x8x8xf32>
    %146 = arith.mulf %144, %145 : vector<2x8x8xf32>
    %147 = vector.broadcast %45 : vector<2x1x8xf32> to vector<2x8x8xf32>
    %148 = arith.addf %146, %147 : vector<2x8x8xf32>
    %cst_50 = arith.constant dense<0xFF800000> : vector<2x8xf32>
    %149 = vector.multi_reduction <maximumf>, %148, %cst_50 [2] : vector<2x8x8xf32> to vector<2x8xf32>
    %150 = vector.shape_cast %149 : vector<2x8xf32> to vector<2x8x1xf32>
    %151 = vector.broadcast %150 : vector<2x8x1xf32> to vector<2x8x8xf32>
    %152 = arith.subf %148, %151 : vector<2x8x8xf32>
    %153 = math.exp %152 : vector<2x8x8xf32>
    %cst_51 = arith.constant dense<0.000000e+00> : vector<2x8xf32>
    %154 = vector.multi_reduction <add>, %153, %cst_51 [2] : vector<2x8x8xf32> to vector<2x8xf32>
    %155 = vector.shape_cast %154 : vector<2x8xf32> to vector<2x8x1xf32>
    %156 = tpu.reciprocal %155 {approx = true} : vector<2x8x1xf32> -> vector<2x8x1xf32>
    %157 = vector.broadcast %156 : vector<2x8x1xf32> to vector<2x8x8xf32>
    %158 = arith.mulf %153, %157 : vector<2x8x8xf32>
    %159 = vector.extract_strided_slice %67 {offsets = [0, 0, 24], sizes = [2, 8, 8], strides = [1, 1, 1]} : vector<2x8x32xf32> to vector<2x8x8xf32>
    "tpu.trace_start"() <{level = 10 : i32, message = "bqk,bkd->bqd"}> : () -> ()
    %cst_52 = arith.constant dense<0.000000e+00> : vector<2x8x8xf32>
    %160 = tpu.matmul %158, %159, %cst_52 {dimension_numbers = #tpu.dot_dimension_numbers<[2], [1], [1], [2], [0, 0, 0, 1, 1, 2], [0], [0]>} : vector<2x8x8xf32>, vector<2x8x8xf32>, vector<2x8x8xf32> -> vector<2x8x8xf32>
    "tpu.trace_stop"() : () -> ()
    %c0_53 = arith.constant 0 : index
    %c24 = arith.constant 24 : index
    %c96_54 = arith.constant 96 : index
    %161 = vector.load %arg6[%c0_53, %c24, %c96_54] : memref<2x32x192xbf16, #tpu.memory_space<vmem>>, vector<1x8x32xbf16>
    %162 = vector.shape_cast %161 : vector<1x8x32xbf16> to vector<8x32xbf16>
    %163 = vector.shape_cast %160 : vector<2x8x8xf32> to vector<16x8xf32>
    %164 = arith.truncf %163 : vector<16x8xf32> to vector<16x8xbf16>
    %cst_55 = arith.constant dense<0.000000e+00> : vector<16x32xf32>
    %165 = tpu.matmul %164, %162, %cst_55 {dimension_numbers = #tpu.dot_dimension_numbers<[1], [0], [0], [1], [0, 0, 1, 1], [], []>} : vector<16x8xbf16>, vector<8x32xbf16>, vector<16x32xf32> -> vector<16x32xf32>
    %166 = arith.addf %141, %165 : vector<16x32xf32>
    %167 = vector.broadcast %49 : vector<1x32xf32> to vector<16x32xf32>
    %168 = arith.addf %166, %167 : vector<16x32xf32>
    %169 = arith.addf %168, %39 : vector<16x32xf32>
    %cst_56 = arith.constant dense<0.000000e+00> : vector<16xf32>
    %170 = vector.multi_reduction <add>, %169, %cst_56 [1] : vector<16x32xf32> to vector<16xf32>
    %171 = vector.shape_cast %170 : vector<16xf32> to vector<16x1xf32>
    %cst_57 = arith.constant 3.200000e+01 : f32
    %172 = vector.broadcast %cst_57 : f32 to vector<16x1xf32>
    %173 = arith.divf %171, %172 : vector<16x1xf32>
    %174 = vector.broadcast %173 : vector<16x1xf32> to vector<16x32xf32>
    %175 = arith.subf %169, %174 : vector<16x32xf32>
    %176 = arith.mulf %175, %175 : vector<16x32xf32>
    %cst_58 = arith.constant dense<0.000000e+00> : vector<16xf32>
    %177 = vector.multi_reduction <add>, %176, %cst_58 [1] : vector<16x32xf32> to vector<16xf32>
    %178 = vector.shape_cast %177 : vector<16xf32> to vector<16x1xf32>
    %cst_59 = arith.constant 3.200000e+01 : f32
    %179 = vector.broadcast %cst_59 : f32 to vector<16x1xf32>
    %180 = arith.divf %178, %179 : vector<16x1xf32>
    %181 = vector.broadcast %173 : vector<16x1xf32> to vector<16x32xf32>
    %182 = arith.subf %169, %181 : vector<16x32xf32>
    %cst_60 = arith.constant 9.99999996E-13 : f32
    %183 = vector.broadcast %cst_60 : f32 to vector<16x1xf32>
    %184 = arith.addf %180, %183 : vector<16x1xf32>
    %185 = math.rsqrt %184 : vector<16x1xf32>
    %186 = vector.broadcast %185 : vector<16x1xf32> to vector<16x32xf32>
    %187 = arith.mulf %182, %186 : vector<16x32xf32>
    %188 = vector.broadcast %50 : vector<1x32xf32> to vector<16x32xf32>
    %189 = arith.mulf %187, %188 : vector<16x32xf32>
    %190 = vector.broadcast %51 : vector<1x32xf32> to vector<16x32xf32>
    %191 = arith.addf %189, %190 : vector<16x32xf32>
    %c0_61 = arith.constant 0 : index
    %c0_62 = arith.constant 0 : index
    %c128 = arith.constant 128 : index
    %192 = vector.load %arg6[%c0_61, %c0_62, %c128] : memref<2x32x192xbf16, #tpu.memory_space<vmem>>, vector<1x32x64xbf16>
    %193 = vector.shape_cast %192 : vector<1x32x64xbf16> to vector<32x64xbf16>
    %194 = arith.truncf %191 : vector<16x32xf32> to vector<16x32xbf16>
    %cst_63 = arith.constant dense<0.000000e+00> : vector<16x64xf32>
    %195 = tpu.matmul %194, %193, %cst_63 {dimension_numbers = #tpu.dot_dimension_numbers<[1], [0], [0], [1], [0, 0, 1, 1], [], []>} : vector<16x32xbf16>, vector<32x64xbf16>, vector<16x64xf32> -> vector<16x64xf32>
    %196 = vector.broadcast %52 : vector<1x64xf32> to vector<16x64xf32>
    %197 = arith.addf %195, %196 : vector<16x64xf32>
    %cst_64 = arith.constant 5.000000e-01 : f32
    %198 = vector.broadcast %cst_64 : f32 to vector<16x64xf32>
    %199 = arith.mulf %198, %197 : vector<16x64xf32>
    %cst_65 = arith.constant 0.707106769 : f32
    %200 = vector.broadcast %cst_65 : f32 to vector<16x64xf32>
    %201 = arith.mulf %197, %200 : vector<16x64xf32>
    %202 = math.erf %201 : vector<16x64xf32>
    %cst_66 = arith.constant 1.000000e+00 : f32
    %203 = vector.broadcast %cst_66 : f32 to vector<16x64xf32>
    %204 = arith.addf %203, %202 : vector<16x64xf32>
    %205 = arith.mulf %199, %204 : vector<16x64xf32>
    %c0_67 = arith.constant 0 : index
    %c0_68 = arith.constant 0 : index
    %c0_69 = arith.constant 0 : index
    %206 = vector.load %arg7[%c0_67, %c0_68, %c0_69] : memref<2x64x32xbf16, #tpu.memory_space<vmem>>, vector<1x64x32xbf16>
    %207 = vector.shape_cast %206 : vector<1x64x32xbf16> to vector<64x32xbf16>
    %208 = arith.truncf %205 : vector<16x64xf32> to vector<16x64xbf16>
    %cst_70 = arith.constant dense<0.000000e+00> : vector<16x32xf32>
    %209 = tpu.matmul %208, %207, %cst_70 {dimension_numbers = #tpu.dot_dimension_numbers<[1], [0], [0], [1], [0, 0, 1, 1], [], []>} : vector<16x64xbf16>, vector<64x32xbf16>, vector<16x32xf32> -> vector<16x32xf32>
    %210 = vector.broadcast %53 : vector<1x32xf32> to vector<16x32xf32>
    %211 = arith.addf %209, %210 : vector<16x32xf32>
    %212 = arith.addf %211, %191 : vector<16x32xf32>
    %cst_71 = arith.constant dense<0.000000e+00> : vector<16xf32>
    %213 = vector.multi_reduction <add>, %212, %cst_71 [1] : vector<16x32xf32> to vector<16xf32>
    %214 = vector.shape_cast %213 : vector<16xf32> to vector<16x1xf32>
    %cst_72 = arith.constant 3.200000e+01 : f32
    %215 = vector.broadcast %cst_72 : f32 to vector<16x1xf32>
    %216 = arith.divf %214, %215 : vector<16x1xf32>
    %217 = vector.broadcast %216 : vector<16x1xf32> to vector<16x32xf32>
    %218 = arith.subf %212, %217 : vector<16x32xf32>
    %219 = arith.mulf %218, %218 : vector<16x32xf32>
    %cst_73 = arith.constant dense<0.000000e+00> : vector<16xf32>
    %220 = vector.multi_reduction <add>, %219, %cst_73 [1] : vector<16x32xf32> to vector<16xf32>
    %221 = vector.shape_cast %220 : vector<16xf32> to vector<16x1xf32>
    %cst_74 = arith.constant 3.200000e+01 : f32
    %222 = vector.broadcast %cst_74 : f32 to vector<16x1xf32>
    %223 = arith.divf %221, %222 : vector<16x1xf32>
    %224 = vector.broadcast %216 : vector<16x1xf32> to vector<16x32xf32>
    %225 = arith.subf %212, %224 : vector<16x32xf32>
    %cst_75 = arith.constant 9.99999996E-13 : f32
    %226 = vector.broadcast %cst_75 : f32 to vector<16x1xf32>
    %227 = arith.addf %223, %226 : vector<16x1xf32>
    %228 = math.rsqrt %227 : vector<16x1xf32>
    %229 = vector.broadcast %228 : vector<16x1xf32> to vector<16x32xf32>
    %230 = arith.mulf %225, %229 : vector<16x32xf32>
    %231 = vector.broadcast %54 : vector<1x32xf32> to vector<16x32xf32>
    %232 = arith.mulf %230, %231 : vector<16x32xf32>
    %233 = vector.broadcast %55 : vector<1x32xf32> to vector<16x32xf32>
    %234 = arith.addf %232, %233 : vector<16x32xf32>
    %c1 = arith.constant 1 : index
    %c0_76 = arith.constant 0 : index
    %c0_77 = arith.constant 0 : index
    %235 = vector.load %arg5[%c1, %c0_76, %c0_77] : memref<2x8x128xf32, #tpu.memory_space<vmem>>, vector<1x8x128xf32>
    %236 = vector.shape_cast %235 : vector<1x8x128xf32> to vector<8x128xf32>
    %237 = vector.extract_strided_slice %236 {offsets = [0, 0], sizes = [1, 96], strides = [1, 1]} : vector<8x128xf32> to vector<1x96xf32>
    %238 = vector.extract_strided_slice %236 {offsets = [1, 0], sizes = [1, 32], strides = [1, 1]} : vector<8x128xf32> to vector<1x32xf32>
    %239 = vector.extract_strided_slice %236 {offsets = [2, 0], sizes = [1, 32], strides = [1, 1]} : vector<8x128xf32> to vector<1x32xf32>
    %240 = vector.extract_strided_slice %236 {offsets = [3, 0], sizes = [1, 32], strides = [1, 1]} : vector<8x128xf32> to vector<1x32xf32>
    %241 = vector.extract_strided_slice %236 {offsets = [4, 0], sizes = [1, 64], strides = [1, 1]} : vector<8x128xf32> to vector<1x64xf32>
    %242 = vector.extract_strided_slice %236 {offsets = [5, 0], sizes = [1, 32], strides = [1, 1]} : vector<8x128xf32> to vector<1x32xf32>
    %243 = vector.extract_strided_slice %236 {offsets = [6, 0], sizes = [1, 32], strides = [1, 1]} : vector<8x128xf32> to vector<1x32xf32>
    %244 = vector.extract_strided_slice %236 {offsets = [7, 0], sizes = [1, 32], strides = [1, 1]} : vector<8x128xf32> to vector<1x32xf32>
    %c1_78 = arith.constant 1 : index
    %c0_79 = arith.constant 0 : index
    %c0_80 = arith.constant 0 : index
    %245 = vector.load %arg6[%c1_78, %c0_79, %c0_80] : memref<2x32x192xbf16, #tpu.memory_space<vmem>>, vector<1x32x96xbf16>
    %246 = vector.shape_cast %245 : vector<1x32x96xbf16> to vector<32x96xbf16>
    %247 = arith.truncf %234 : vector<16x32xf32> to vector<16x32xbf16>
    %cst_81 = arith.constant dense<0.000000e+00> : vector<16x96xf32>
    %248 = tpu.matmul %247, %246, %cst_81 {dimension_numbers = #tpu.dot_dimension_numbers<[1], [0], [0], [1], [0, 0, 1, 1], [], []>} : vector<16x32xbf16>, vector<32x96xbf16>, vector<16x96xf32> -> vector<16x96xf32>
    %249 = vector.broadcast %237 : vector<1x96xf32> to vector<16x96xf32>
    %250 = arith.addf %248, %249 : vector<16x96xf32>
    %251 = vector.extract_strided_slice %250 {offsets = [0, 0], sizes = [16, 32], strides = [1, 1]} : vector<16x96xf32> to vector<16x32xf32>
    %252 = vector.shape_cast %251 : vector<16x32xf32> to vector<2x8x32xf32>
    %253 = vector.extract_strided_slice %250 {offsets = [0, 32], sizes = [16, 32], strides = [1, 1]} : vector<16x96xf32> to vector<16x32xf32>
    %254 = vector.shape_cast %253 : vector<16x32xf32> to vector<2x8x32xf32>
    %255 = vector.extract_strided_slice %250 {offsets = [0, 64], sizes = [16, 32], strides = [1, 1]} : vector<16x96xf32> to vector<16x32xf32>
    %256 = vector.shape_cast %255 : vector<16x32xf32> to vector<2x8x32xf32>
    %257 = vector.extract_strided_slice %252 {offsets = [0, 0, 0], sizes = [2, 8, 8], strides = [1, 1, 1]} : vector<2x8x32xf32> to vector<2x8x8xf32>
    %258 = vector.extract_strided_slice %254 {offsets = [0, 0, 0], sizes = [2, 8, 8], strides = [1, 1, 1]} : vector<2x8x32xf32> to vector<2x8x8xf32>
    "tpu.trace_start"() <{level = 10 : i32, message = "bqd,bkd->bqk"}> : () -> ()
    %cst_82 = arith.constant dense<0.000000e+00> : vector<2x8x8xf32>
    %259 = tpu.matmul %257, %258, %cst_82 {dimension_numbers = #tpu.dot_dimension_numbers<[2], [2], [1], [1], [0, 0, 0, 1, 1, 1], [0], [0]>} : vector<2x8x8xf32>, vector<2x8x8xf32>, vector<2x8x8xf32> -> vector<2x8x8xf32>
    "tpu.trace_stop"() : () -> ()
    %cst_83 = arith.constant 0.353553385 : f32
    %260 = vector.broadcast %cst_83 : f32 to vector<2x8x8xf32>
    %261 = arith.mulf %259, %260 : vector<2x8x8xf32>
    %262 = vector.broadcast %45 : vector<2x1x8xf32> to vector<2x8x8xf32>
    %263 = arith.addf %261, %262 : vector<2x8x8xf32>
    %cst_84 = arith.constant dense<0xFF800000> : vector<2x8xf32>
    %264 = vector.multi_reduction <maximumf>, %263, %cst_84 [2] : vector<2x8x8xf32> to vector<2x8xf32>
    %265 = vector.shape_cast %264 : vector<2x8xf32> to vector<2x8x1xf32>
    %266 = vector.broadcast %265 : vector<2x8x1xf32> to vector<2x8x8xf32>
    %267 = arith.subf %263, %266 : vector<2x8x8xf32>
    %268 = math.exp %267 : vector<2x8x8xf32>
    %cst_85 = arith.constant dense<0.000000e+00> : vector<2x8xf32>
    %269 = vector.multi_reduction <add>, %268, %cst_85 [2] : vector<2x8x8xf32> to vector<2x8xf32>
    %270 = vector.shape_cast %269 : vector<2x8xf32> to vector<2x8x1xf32>
    %271 = tpu.reciprocal %270 {approx = true} : vector<2x8x1xf32> -> vector<2x8x1xf32>
    %272 = vector.broadcast %271 : vector<2x8x1xf32> to vector<2x8x8xf32>
    %273 = arith.mulf %268, %272 : vector<2x8x8xf32>
    %274 = vector.extract_strided_slice %256 {offsets = [0, 0, 0], sizes = [2, 8, 8], strides = [1, 1, 1]} : vector<2x8x32xf32> to vector<2x8x8xf32>
    "tpu.trace_start"() <{level = 10 : i32, message = "bqk,bkd->bqd"}> : () -> ()
    %cst_86 = arith.constant dense<0.000000e+00> : vector<2x8x8xf32>
    %275 = tpu.matmul %273, %274, %cst_86 {dimension_numbers = #tpu.dot_dimension_numbers<[2], [1], [1], [2], [0, 0, 0, 1, 1, 2], [0], [0]>} : vector<2x8x8xf32>, vector<2x8x8xf32>, vector<2x8x8xf32> -> vector<2x8x8xf32>
    "tpu.trace_stop"() : () -> ()
    %c1_87 = arith.constant 1 : index
    %c0_88 = arith.constant 0 : index
    %c96_89 = arith.constant 96 : index
    %276 = vector.load %arg6[%c1_87, %c0_88, %c96_89] : memref<2x32x192xbf16, #tpu.memory_space<vmem>>, vector<1x8x32xbf16>
    %277 = vector.shape_cast %276 : vector<1x8x32xbf16> to vector<8x32xbf16>
    %278 = vector.shape_cast %275 : vector<2x8x8xf32> to vector<16x8xf32>
    %279 = arith.truncf %278 : vector<16x8xf32> to vector<16x8xbf16>
    %cst_90 = arith.constant dense<0.000000e+00> : vector<16x32xf32>
    %280 = tpu.matmul %279, %277, %cst_90 {dimension_numbers = #tpu.dot_dimension_numbers<[1], [0], [0], [1], [0, 0, 1, 1], [], []>} : vector<16x8xbf16>, vector<8x32xbf16>, vector<16x32xf32> -> vector<16x32xf32>
    %281 = vector.extract_strided_slice %252 {offsets = [0, 0, 8], sizes = [2, 8, 8], strides = [1, 1, 1]} : vector<2x8x32xf32> to vector<2x8x8xf32>
    %282 = vector.extract_strided_slice %254 {offsets = [0, 0, 8], sizes = [2, 8, 8], strides = [1, 1, 1]} : vector<2x8x32xf32> to vector<2x8x8xf32>
    "tpu.trace_start"() <{level = 10 : i32, message = "bqd,bkd->bqk"}> : () -> ()
    %cst_91 = arith.constant dense<0.000000e+00> : vector<2x8x8xf32>
    %283 = tpu.matmul %281, %282, %cst_91 {dimension_numbers = #tpu.dot_dimension_numbers<[2], [2], [1], [1], [0, 0, 0, 1, 1, 1], [0], [0]>} : vector<2x8x8xf32>, vector<2x8x8xf32>, vector<2x8x8xf32> -> vector<2x8x8xf32>
    "tpu.trace_stop"() : () -> ()
    %cst_92 = arith.constant 0.353553385 : f32
    %284 = vector.broadcast %cst_92 : f32 to vector<2x8x8xf32>
    %285 = arith.mulf %283, %284 : vector<2x8x8xf32>
    %286 = vector.broadcast %45 : vector<2x1x8xf32> to vector<2x8x8xf32>
    %287 = arith.addf %285, %286 : vector<2x8x8xf32>
    %cst_93 = arith.constant dense<0xFF800000> : vector<2x8xf32>
    %288 = vector.multi_reduction <maximumf>, %287, %cst_93 [2] : vector<2x8x8xf32> to vector<2x8xf32>
    %289 = vector.shape_cast %288 : vector<2x8xf32> to vector<2x8x1xf32>
    %290 = vector.broadcast %289 : vector<2x8x1xf32> to vector<2x8x8xf32>
    %291 = arith.subf %287, %290 : vector<2x8x8xf32>
    %292 = math.exp %291 : vector<2x8x8xf32>
    %cst_94 = arith.constant dense<0.000000e+00> : vector<2x8xf32>
    %293 = vector.multi_reduction <add>, %292, %cst_94 [2] : vector<2x8x8xf32> to vector<2x8xf32>
    %294 = vector.shape_cast %293 : vector<2x8xf32> to vector<2x8x1xf32>
    %295 = tpu.reciprocal %294 {approx = true} : vector<2x8x1xf32> -> vector<2x8x1xf32>
    %296 = vector.broadcast %295 : vector<2x8x1xf32> to vector<2x8x8xf32>
    %297 = arith.mulf %292, %296 : vector<2x8x8xf32>
    %298 = vector.extract_strided_slice %256 {offsets = [0, 0, 8], sizes = [2, 8, 8], strides = [1, 1, 1]} : vector<2x8x32xf32> to vector<2x8x8xf32>
    "tpu.trace_start"() <{level = 10 : i32, message = "bqk,bkd->bqd"}> : () -> ()
    %cst_95 = arith.constant dense<0.000000e+00> : vector<2x8x8xf32>
    %299 = tpu.matmul %297, %298, %cst_95 {dimension_numbers = #tpu.dot_dimension_numbers<[2], [1], [1], [2], [0, 0, 0, 1, 1, 2], [0], [0]>} : vector<2x8x8xf32>, vector<2x8x8xf32>, vector<2x8x8xf32> -> vector<2x8x8xf32>
    "tpu.trace_stop"() : () -> ()
    %c1_96 = arith.constant 1 : index
    %c8_97 = arith.constant 8 : index
    %c96_98 = arith.constant 96 : index
    %300 = vector.load %arg6[%c1_96, %c8_97, %c96_98] : memref<2x32x192xbf16, #tpu.memory_space<vmem>>, vector<1x8x32xbf16>
    %301 = vector.shape_cast %300 : vector<1x8x32xbf16> to vector<8x32xbf16>
    %302 = vector.shape_cast %299 : vector<2x8x8xf32> to vector<16x8xf32>
    %303 = arith.truncf %302 : vector<16x8xf32> to vector<16x8xbf16>
    %cst_99 = arith.constant dense<0.000000e+00> : vector<16x32xf32>
    %304 = tpu.matmul %303, %301, %cst_99 {dimension_numbers = #tpu.dot_dimension_numbers<[1], [0], [0], [1], [0, 0, 1, 1], [], []>} : vector<16x8xbf16>, vector<8x32xbf16>, vector<16x32xf32> -> vector<16x32xf32>
    %305 = arith.addf %280, %304 : vector<16x32xf32>
    %306 = vector.extract_strided_slice %252 {offsets = [0, 0, 16], sizes = [2, 8, 8], strides = [1, 1, 1]} : vector<2x8x32xf32> to vector<2x8x8xf32>
    %307 = vector.extract_strided_slice %254 {offsets = [0, 0, 16], sizes = [2, 8, 8], strides = [1, 1, 1]} : vector<2x8x32xf32> to vector<2x8x8xf32>
    "tpu.trace_start"() <{level = 10 : i32, message = "bqd,bkd->bqk"}> : () -> ()
    %cst_100 = arith.constant dense<0.000000e+00> : vector<2x8x8xf32>
    %308 = tpu.matmul %306, %307, %cst_100 {dimension_numbers = #tpu.dot_dimension_numbers<[2], [2], [1], [1], [0, 0, 0, 1, 1, 1], [0], [0]>} : vector<2x8x8xf32>, vector<2x8x8xf32>, vector<2x8x8xf32> -> vector<2x8x8xf32>
    "tpu.trace_stop"() : () -> ()
    %cst_101 = arith.constant 0.353553385 : f32
    %309 = vector.broadcast %cst_101 : f32 to vector<2x8x8xf32>
    %310 = arith.mulf %308, %309 : vector<2x8x8xf32>
    %311 = vector.broadcast %45 : vector<2x1x8xf32> to vector<2x8x8xf32>
    %312 = arith.addf %310, %311 : vector<2x8x8xf32>
    %cst_102 = arith.constant dense<0xFF800000> : vector<2x8xf32>
    %313 = vector.multi_reduction <maximumf>, %312, %cst_102 [2] : vector<2x8x8xf32> to vector<2x8xf32>
    %314 = vector.shape_cast %313 : vector<2x8xf32> to vector<2x8x1xf32>
    %315 = vector.broadcast %314 : vector<2x8x1xf32> to vector<2x8x8xf32>
    %316 = arith.subf %312, %315 : vector<2x8x8xf32>
    %317 = math.exp %316 : vector<2x8x8xf32>
    %cst_103 = arith.constant dense<0.000000e+00> : vector<2x8xf32>
    %318 = vector.multi_reduction <add>, %317, %cst_103 [2] : vector<2x8x8xf32> to vector<2x8xf32>
    %319 = vector.shape_cast %318 : vector<2x8xf32> to vector<2x8x1xf32>
    %320 = tpu.reciprocal %319 {approx = true} : vector<2x8x1xf32> -> vector<2x8x1xf32>
    %321 = vector.broadcast %320 : vector<2x8x1xf32> to vector<2x8x8xf32>
    %322 = arith.mulf %317, %321 : vector<2x8x8xf32>
    %323 = vector.extract_strided_slice %256 {offsets = [0, 0, 16], sizes = [2, 8, 8], strides = [1, 1, 1]} : vector<2x8x32xf32> to vector<2x8x8xf32>
    "tpu.trace_start"() <{level = 10 : i32, message = "bqk,bkd->bqd"}> : () -> ()
    %cst_104 = arith.constant dense<0.000000e+00> : vector<2x8x8xf32>
    %324 = tpu.matmul %322, %323, %cst_104 {dimension_numbers = #tpu.dot_dimension_numbers<[2], [1], [1], [2], [0, 0, 0, 1, 1, 2], [0], [0]>} : vector<2x8x8xf32>, vector<2x8x8xf32>, vector<2x8x8xf32> -> vector<2x8x8xf32>
    "tpu.trace_stop"() : () -> ()
    %c1_105 = arith.constant 1 : index
    %c16_106 = arith.constant 16 : index
    %c96_107 = arith.constant 96 : index
    %325 = vector.load %arg6[%c1_105, %c16_106, %c96_107] : memref<2x32x192xbf16, #tpu.memory_space<vmem>>, vector<1x8x32xbf16>
    %326 = vector.shape_cast %325 : vector<1x8x32xbf16> to vector<8x32xbf16>
    %327 = vector.shape_cast %324 : vector<2x8x8xf32> to vector<16x8xf32>
    %328 = arith.truncf %327 : vector<16x8xf32> to vector<16x8xbf16>
    %cst_108 = arith.constant dense<0.000000e+00> : vector<16x32xf32>
    %329 = tpu.matmul %328, %326, %cst_108 {dimension_numbers = #tpu.dot_dimension_numbers<[1], [0], [0], [1], [0, 0, 1, 1], [], []>} : vector<16x8xbf16>, vector<8x32xbf16>, vector<16x32xf32> -> vector<16x32xf32>
    %330 = arith.addf %305, %329 : vector<16x32xf32>
    %331 = vector.extract_strided_slice %252 {offsets = [0, 0, 24], sizes = [2, 8, 8], strides = [1, 1, 1]} : vector<2x8x32xf32> to vector<2x8x8xf32>
    %332 = vector.extract_strided_slice %254 {offsets = [0, 0, 24], sizes = [2, 8, 8], strides = [1, 1, 1]} : vector<2x8x32xf32> to vector<2x8x8xf32>
    "tpu.trace_start"() <{level = 10 : i32, message = "bqd,bkd->bqk"}> : () -> ()
    %cst_109 = arith.constant dense<0.000000e+00> : vector<2x8x8xf32>
    %333 = tpu.matmul %331, %332, %cst_109 {dimension_numbers = #tpu.dot_dimension_numbers<[2], [2], [1], [1], [0, 0, 0, 1, 1, 1], [0], [0]>} : vector<2x8x8xf32>, vector<2x8x8xf32>, vector<2x8x8xf32> -> vector<2x8x8xf32>
    "tpu.trace_stop"() : () -> ()
    %cst_110 = arith.constant 0.353553385 : f32
    %334 = vector.broadcast %cst_110 : f32 to vector<2x8x8xf32>
    %335 = arith.mulf %333, %334 : vector<2x8x8xf32>
    %336 = vector.broadcast %45 : vector<2x1x8xf32> to vector<2x8x8xf32>
    %337 = arith.addf %335, %336 : vector<2x8x8xf32>
    %cst_111 = arith.constant dense<0xFF800000> : vector<2x8xf32>
    %338 = vector.multi_reduction <maximumf>, %337, %cst_111 [2] : vector<2x8x8xf32> to vector<2x8xf32>
    %339 = vector.shape_cast %338 : vector<2x8xf32> to vector<2x8x1xf32>
    %340 = vector.broadcast %339 : vector<2x8x1xf32> to vector<2x8x8xf32>
    %341 = arith.subf %337, %340 : vector<2x8x8xf32>
    %342 = math.exp %341 : vector<2x8x8xf32>
    %cst_112 = arith.constant dense<0.000000e+00> : vector<2x8xf32>
    %343 = vector.multi_reduction <add>, %342, %cst_112 [2] : vector<2x8x8xf32> to vector<2x8xf32>
    %344 = vector.shape_cast %343 : vector<2x8xf32> to vector<2x8x1xf32>
    %345 = tpu.reciprocal %344 {approx = true} : vector<2x8x1xf32> -> vector<2x8x1xf32>
    %346 = vector.broadcast %345 : vector<2x8x1xf32> to vector<2x8x8xf32>
    %347 = arith.mulf %342, %346 : vector<2x8x8xf32>
    %348 = vector.extract_strided_slice %256 {offsets = [0, 0, 24], sizes = [2, 8, 8], strides = [1, 1, 1]} : vector<2x8x32xf32> to vector<2x8x8xf32>
    "tpu.trace_start"() <{level = 10 : i32, message = "bqk,bkd->bqd"}> : () -> ()
    %cst_113 = arith.constant dense<0.000000e+00> : vector<2x8x8xf32>
    %349 = tpu.matmul %347, %348, %cst_113 {dimension_numbers = #tpu.dot_dimension_numbers<[2], [1], [1], [2], [0, 0, 0, 1, 1, 2], [0], [0]>} : vector<2x8x8xf32>, vector<2x8x8xf32>, vector<2x8x8xf32> -> vector<2x8x8xf32>
    "tpu.trace_stop"() : () -> ()
    %c1_114 = arith.constant 1 : index
    %c24_115 = arith.constant 24 : index
    %c96_116 = arith.constant 96 : index
    %350 = vector.load %arg6[%c1_114, %c24_115, %c96_116] : memref<2x32x192xbf16, #tpu.memory_space<vmem>>, vector<1x8x32xbf16>
    %351 = vector.shape_cast %350 : vector<1x8x32xbf16> to vector<8x32xbf16>
    %352 = vector.shape_cast %349 : vector<2x8x8xf32> to vector<16x8xf32>
    %353 = arith.truncf %352 : vector<16x8xf32> to vector<16x8xbf16>
    %cst_117 = arith.constant dense<0.000000e+00> : vector<16x32xf32>
    %354 = tpu.matmul %353, %351, %cst_117 {dimension_numbers = #tpu.dot_dimension_numbers<[1], [0], [0], [1], [0, 0, 1, 1], [], []>} : vector<16x8xbf16>, vector<8x32xbf16>, vector<16x32xf32> -> vector<16x32xf32>
    %355 = arith.addf %330, %354 : vector<16x32xf32>
    %356 = vector.broadcast %238 : vector<1x32xf32> to vector<16x32xf32>
    %357 = arith.addf %355, %356 : vector<16x32xf32>
    %358 = arith.addf %357, %234 : vector<16x32xf32>
    %cst_118 = arith.constant dense<0.000000e+00> : vector<16xf32>
    %359 = vector.multi_reduction <add>, %358, %cst_118 [1] : vector<16x32xf32> to vector<16xf32>
    %360 = vector.shape_cast %359 : vector<16xf32> to vector<16x1xf32>
    %cst_119 = arith.constant 3.200000e+01 : f32
    %361 = vector.broadcast %cst_119 : f32 to vector<16x1xf32>
    %362 = arith.divf %360, %361 : vector<16x1xf32>
    %363 = vector.broadcast %362 : vector<16x1xf32> to vector<16x32xf32>
    %364 = arith.subf %358, %363 : vector<16x32xf32>
    %365 = arith.mulf %364, %364 : vector<16x32xf32>
    %cst_120 = arith.constant dense<0.000000e+00> : vector<16xf32>
    %366 = vector.multi_reduction <add>, %365, %cst_120 [1] : vector<16x32xf32> to vector<16xf32>
    %367 = vector.shape_cast %366 : vector<16xf32> to vector<16x1xf32>
    %cst_121 = arith.constant 3.200000e+01 : f32
    %368 = vector.broadcast %cst_121 : f32 to vector<16x1xf32>
    %369 = arith.divf %367, %368 : vector<16x1xf32>
    %370 = vector.broadcast %362 : vector<16x1xf32> to vector<16x32xf32>
    %371 = arith.subf %358, %370 : vector<16x32xf32>
    %cst_122 = arith.constant 9.99999996E-13 : f32
    %372 = vector.broadcast %cst_122 : f32 to vector<16x1xf32>
    %373 = arith.addf %369, %372 : vector<16x1xf32>
    %374 = math.rsqrt %373 : vector<16x1xf32>
    %375 = vector.broadcast %374 : vector<16x1xf32> to vector<16x32xf32>
    %376 = arith.mulf %371, %375 : vector<16x32xf32>
    %377 = vector.broadcast %239 : vector<1x32xf32> to vector<16x32xf32>
    %378 = arith.mulf %376, %377 : vector<16x32xf32>
    %379 = vector.broadcast %240 : vector<1x32xf32> to vector<16x32xf32>
    %380 = arith.addf %378, %379 : vector<16x32xf32>
    %c1_123 = arith.constant 1 : index
    %c0_124 = arith.constant 0 : index
    %c128_125 = arith.constant 128 : index
    %381 = vector.load %arg6[%c1_123, %c0_124, %c128_125] : memref<2x32x192xbf16, #tpu.memory_space<vmem>>, vector<1x32x64xbf16>
    %382 = vector.shape_cast %381 : vector<1x32x64xbf16> to vector<32x64xbf16>
    %383 = arith.truncf %380 : vector<16x32xf32> to vector<16x32xbf16>
    %cst_126 = arith.constant dense<0.000000e+00> : vector<16x64xf32>
    %384 = tpu.matmul %383, %382, %cst_126 {dimension_numbers = #tpu.dot_dimension_numbers<[1], [0], [0], [1], [0, 0, 1, 1], [], []>} : vector<16x32xbf16>, vector<32x64xbf16>, vector<16x64xf32> -> vector<16x64xf32>
    %385 = vector.broadcast %241 : vector<1x64xf32> to vector<16x64xf32>
    %386 = arith.addf %384, %385 : vector<16x64xf32>
    %cst_127 = arith.constant 5.000000e-01 : f32
    %387 = vector.broadcast %cst_127 : f32 to vector<16x64xf32>
    %388 = arith.mulf %387, %386 : vector<16x64xf32>
    %cst_128 = arith.constant 0.707106769 : f32
    %389 = vector.broadcast %cst_128 : f32 to vector<16x64xf32>
    %390 = arith.mulf %386, %389 : vector<16x64xf32>
    %391 = math.erf %390 : vector<16x64xf32>
    %cst_129 = arith.constant 1.000000e+00 : f32
    %392 = vector.broadcast %cst_129 : f32 to vector<16x64xf32>
    %393 = arith.addf %392, %391 : vector<16x64xf32>
    %394 = arith.mulf %388, %393 : vector<16x64xf32>
    %c1_130 = arith.constant 1 : index
    %c0_131 = arith.constant 0 : index
    %c0_132 = arith.constant 0 : index
    %395 = vector.load %arg7[%c1_130, %c0_131, %c0_132] : memref<2x64x32xbf16, #tpu.memory_space<vmem>>, vector<1x64x32xbf16>
    %396 = vector.shape_cast %395 : vector<1x64x32xbf16> to vector<64x32xbf16>
    %397 = arith.truncf %394 : vector<16x64xf32> to vector<16x64xbf16>
    %cst_133 = arith.constant dense<0.000000e+00> : vector<16x32xf32>
    %398 = tpu.matmul %397, %396, %cst_133 {dimension_numbers = #tpu.dot_dimension_numbers<[1], [0], [0], [1], [0, 0, 1, 1], [], []>} : vector<16x64xbf16>, vector<64x32xbf16>, vector<16x32xf32> -> vector<16x32xf32>
    %399 = vector.broadcast %242 : vector<1x32xf32> to vector<16x32xf32>
    %400 = arith.addf %398, %399 : vector<16x32xf32>
    %401 = arith.addf %400, %380 : vector<16x32xf32>
    %cst_134 = arith.constant dense<0.000000e+00> : vector<16xf32>
    %402 = vector.multi_reduction <add>, %401, %cst_134 [1] : vector<16x32xf32> to vector<16xf32>
    %403 = vector.shape_cast %402 : vector<16xf32> to vector<16x1xf32>
    %cst_135 = arith.constant 3.200000e+01 : f32
    %404 = vector.broadcast %cst_135 : f32 to vector<16x1xf32>
    %405 = arith.divf %403, %404 : vector<16x1xf32>
    %406 = vector.broadcast %405 : vector<16x1xf32> to vector<16x32xf32>
    %407 = arith.subf %401, %406 : vector<16x32xf32>
    %408 = arith.mulf %407, %407 : vector<16x32xf32>
    %cst_136 = arith.constant dense<0.000000e+00> : vector<16xf32>
    %409 = vector.multi_reduction <add>, %408, %cst_136 [1] : vector<16x32xf32> to vector<16xf32>
    %410 = vector.shape_cast %409 : vector<16xf32> to vector<16x1xf32>
    %cst_137 = arith.constant 3.200000e+01 : f32
    %411 = vector.broadcast %cst_137 : f32 to vector<16x1xf32>
    %412 = arith.divf %410, %411 : vector<16x1xf32>
    %413 = vector.broadcast %405 : vector<16x1xf32> to vector<16x32xf32>
    %414 = arith.subf %401, %413 : vector<16x32xf32>
    %cst_138 = arith.constant 9.99999996E-13 : f32
    %415 = vector.broadcast %cst_138 : f32 to vector<16x1xf32>
    %416 = arith.addf %412, %415 : vector<16x1xf32>
    %417 = math.rsqrt %416 : vector<16x1xf32>
    %418 = vector.broadcast %417 : vector<16x1xf32> to vector<16x32xf32>
    %419 = arith.mulf %414, %418 : vector<16x32xf32>
    %420 = vector.broadcast %243 : vector<1x32xf32> to vector<16x32xf32>
    %421 = arith.mulf %419, %420 : vector<16x32xf32>
    %422 = vector.broadcast %244 : vector<1x32xf32> to vector<16x32xf32>
    %423 = arith.addf %421, %422 : vector<16x32xf32>
    %c0_139 = arith.constant 0 : index
    %c0_140 = arith.constant 0 : index
    %424 = vector.load %arg9[%c0_139, %c0_140] : memref<16x32xf32, #tpu.memory_space<vmem>>, vector<16x32xf32>
    tpu.vector_store %arg9[%c0_139, %c0_140], %423 {strides = array<i32>} : memref<16x32xf32, #tpu.memory_space<vmem>>, vector<16x32xf32>,
    %425 = vector.extract_strided_slice %423 {offsets = [0, 0], sizes = [1, 32], strides = [1, 1]} : vector<16x32xf32> to vector<1x32xf32>
    %c0_141 = arith.constant 0 : index
    %c0_142 = arith.constant 0 : index
    %426 = vector.load %arg8[%c0_141, %c0_142] : memref<32x32xbf16, #tpu.memory_space<vmem>>, vector<32x32xbf16>
    %427 = arith.truncf %425 : vector<1x32xf32> to vector<1x32xbf16>
    %cst_143 = arith.constant dense<0.000000e+00> : vector<1x32xf32>
    %428 = tpu.matmul %427, %426, %cst_143 {dimension_numbers = #tpu.dot_dimension_numbers<[1], [0], [0], [1], [0, 0, 1, 1], [], []>} : vector<1x32xbf16>, vector<32x32xbf16>, vector<1x32xf32> -> vector<1x32xf32>
    %429 = arith.addf %428, %3 : vector<1x32xf32>
    %430 = math.tanh %429 : vector<1x32xf32>
    %c0_144 = arith.constant 0 : index
    %c0_145 = arith.constant 0 : index
    %431 = vector.load %arg10[%c0_144, %c0_145] : memref<2x32xf32, #tpu.memory_space<vmem>>, vector<1x32xf32>
    tpu.vector_store %arg10[%c0_144, %c0_145], %430 {strides = array<i32>} : memref<2x32xf32, #tpu.memory_space<vmem>>, vector<1x32xf32>,
    %432 = vector.extract_strided_slice %423 {offsets = [8, 0], sizes = [1, 32], strides = [1, 1]} : vector<16x32xf32> to vector<1x32xf32>
    %c0_146 = arith.constant 0 : index
    %c0_147 = arith.constant 0 : index
    %433 = vector.load %arg8[%c0_146, %c0_147] : memref<32x32xbf16, #tpu.memory_space<vmem>>, vector<32x32xbf16>
    %434 = arith.truncf %432 : vector<1x32xf32> to vector<1x32xbf16>
    %cst_148 = arith.constant dense<0.000000e+00> : vector<1x32xf32>
    %435 = tpu.matmul %434, %433, %cst_148 {dimension_numbers = #tpu.dot_dimension_numbers<[1], [0], [0], [1], [0, 0, 1, 1], [], []>} : vector<1x32xbf16>, vector<32x32xbf16>, vector<1x32xf32> -> vector<1x32xf32>
    %436 = arith.addf %435, %3 : vector<1x32xf32>
    %437 = math.tanh %436 : vector<1x32xf32>
    %c1_149 = arith.constant 1 : index
    %c0_150 = arith.constant 0 : index
    %438 = vector.load %arg10[%c1_149, %c0_150] : memref<2x32xf32, #tpu.memory_space<vmem>>, vector<1x32xf32>
    tpu.vector_store %arg10[%c1_149, %c0_150], %437 {strides = array<i32>} : memref<2x32xf32, #tpu.memory_space<vmem>>, vector<1x32xf32>,
    return
  }
}

</mosaic_0001>

<bundles_post_ra>
// kernel: bert_forward.1
= control target key start
LH: loop header
LB: loop body
LE: loop exit
PB: predicated region body
PF: predicated region fallthrough
CT: control target
= control target key end

     0   :  { %16 = vsyncpa [#allocation3], 0  ;;  %v4844_v2 = vmov 0   ;;  %s5609_s0 = inlined_call_operand.vmem [shape: s32[16,1], index: 0, kind: input, shape index: {}]   ;;  %s5610_s1 = inlined_call_operand.vmem [shape: s32[2,1,8], index: 1, kind: input, shape index: {}]   ;;  %s5611_s2 = inlined_call_operand.vmem [shape: f32[128,32], index: 2, kind: input, shape index: {}]   ;;  %s5612_s3 = inlined_call_operand.vmem [shape: f32[16,32], index: 3, kind: input, shape index: {}]   ;;  %s5613_s4 = inlined_call_operand.vmem [shape: f32[4,32], index: 4, kind: input, shape index: {}]   ;;  %s5614_s5 = inlined_call_operand.vmem [shape: f32[2,8,128], index: 5, kind: input, shape index: {}]   ;;  %s5615_s6 = inlined_call_operand.vmem [shape: bf16[2,32,192], index: 6, kind: input, shape index: {}]   ;;  %s5616_s7 = inlined_call_operand.vmem [shape: bf16[2,64,32], index: 7, kind: input, shape index: {}]   ;;  %s5617_s8 = inlined_call_operand.vmem [shape: bf16[32,32], index: 8, kind: input, shape index: {}]   ;;  %s5618_s9 = inlined_call_operand.hbm [shape: f32[16,32], index: 9, kind: output, shape index: {0}]   ;;  %s5619_s10 = inlined_call_operand.hbm [shape: f32[2,32], index: 10, kind: output, shape index: {1}]  }
   0x1   :  { %v38_v0 = vld [vmem:[%s5609_s0] sm:$0xff]  ;;  %v69_v1 = vld [vmem:[%s5611_s2 + $0x78] sm:$0xff]  ;;  %4674 = vset.pattern.permute.xlu0 %v4844_v2  ;;  %v68_v3 = vld [vmem:[%s5611_s2 + $0x70] sm:$0xff] }
   0x2   :  { %4339 = vmatprep.subr.mxu0 %v69_v1  ;;  %43 = vperm.xlu0 %4674, %v38_v0   ;;  %v67_v4 = vld [vmem:[%s5611_s2 + $0x68] sm:$0xff]  ;;  %v66_v6 = vld [vmem:[%s5611_s2 + $0x60] sm:$0xff]  ;;  %v65_v7 = vld [vmem:[%s5611_s2 + $0x58] sm:$0xff] }
   0x3   :  { %4340 = vmatpush3.msra.mxu0 %v69_v1  ;;  %v39_v5 = vld [vmem:[%s5609_s0 + $0x8] sm:$0xff]  ;;  %v64_v8 = vld [vmem:[%s5611_s2 + $0x50] sm:$0xff]  ;;  %v62_v10 = vld [vmem:[%s5611_s2 + $0x40] sm:$0xff] }
   0x4   :  { %4341 = vmatprep.subr.mxu0 %v68_v3  ;;  %v63_v9 = vld [vmem:[%s5611_s2 + $0x48] sm:$0xff]  ;;  %v61_v11 = vld [vmem:[%s5611_s2 + $0x38] sm:$0xff]  ;;  %v60_v12 = vld [vmem:[%s5611_s2 + $0x30] sm:$0xff] }
   0x5   :  { %4342 = vmatpush3.msra.mxu0 %v68_v3  ;;  %v59_v13 = vld [vmem:[%s5611_s2 + $0x28] sm:$0xff]  ;;  %v58_v14 = vld [vmem:[%s5611_s2 + $0x20] sm:$0xff]  ;;  %v57_v15 = vld [vmem:[%s5611_s2 + $0x18] sm:$0xff] }
   0x6   :  { %4343 = vmatprep.subr.mxu0 %v67_v4  ;;  %46 = vperm.xlu0 %4674, %v39_v5  }
   0x7   :  { %4344 = vmatpush3.msra.mxu0 %v67_v4 }
   0x8   :  { %4345 = vmatprep.subr.mxu0 %v66_v6 }
   0x9   :  { %4346 = vmatpush3.msra.mxu0 %v66_v6 }
   0xa   :  { %4347 = vmatprep.subr.mxu0 %v65_v7 }
   0xb   :  { %4348 = vmatpush3.msra.mxu0 %v65_v7 }
   0xc   :  { %4349 = vmatprep.subr.mxu0 %v64_v8 }
   0xd   :  { %4350 = vmatpush3.msra.mxu0 %v64_v8 }
   0xe   :  { %4351 = vmatprep.subr.mxu0 %v63_v9 }
   0xf   :  { %4352 = vmatpush3.msra.mxu0 %v63_v9 }
  0x10   :  { %4353 = vmatprep.subr.mxu0 %v62_v10 }
  0x11   :  { %4354 = vmatpush3.msra.mxu0 %v62_v10 }
  0x12   :  { %4355 = vmatprep.subr.mxu0 %v61_v11 }
  0x13   :  { %4356 = vmatpush3.msra.mxu0 %v61_v11 }
  0x14   :  { %4357 = vmatprep.subr.mxu0 %v60_v12 }
  0x15   :  { %4358 = vmatpush3.msra.mxu0 %v60_v12 }
  0x16   :  { %4359 = vmatprep.subr.mxu0 %v59_v13 }
  0x17   :  { %4360 = vmatpush3.msra.mxu0 %v59_v13 }
  0x18   :  { %17 = vsyncpa [#allocation5], 0  ;;  %4361 = vmatprep.subr.mxu0 %v58_v14  ;;  %v56_v16 = vld [vmem:[%s5611_s2 + $0x10] sm:$0xff]  ;;  %v55_v17 = vld [vmem:[%s5611_s2 + $0x8] sm:$0xff]  ;;  %v40_v19 = vlaneseq  ;;  %v4845_v22 = vmov 1.0   ;;  %vm146_vm2 = vcmask 261120  }
  0x19   :  { %4362 = vmatpush3.msra.mxu0 %v58_v14  ;;  %v54_v18 = vld [vmem:[%s5611_s2] sm:$0xff]  ;;  %v4675_v41 = vld [vmem:[%s5615_s6 + $0x10] ss:$8 sps:$4 sm:$0xff]   ;;  %v4846_v42 = vmov 0.0   ;;  %vm4847_vm3 = vmmov 0   ;;  %s4848_s15 = smov 96  }
  0x1a   :  { %4363 = vmatprep.subr.mxu0 %v57_v15  ;;  %v41_v20 = vand.u32 127, %v40_v19  ;;  %v70_v25 = vld [vmem:[%s5612_s3] sm:$0xff]  ;;  %4374 = vmatprep.subr.bf16.mxu1 %v4846_v42  ;;  %v4994_v50 = vshrl.u32 %v40_v19, 7  ;;  %vm263_vm4 = vcmask 64512   ;;  %s4850_s20 = smov 88   ;;  %s4851_s21 = smov 120  }
  0x1b   :  { %4364 = vmatpush3.msra.mxu0 %v57_v15  ;;  %4378 = vmatprep.mubr.msk.bf16.mxu1 %vm4847_vm3, %v4846_v42  ;;  %v4676_v43 = vld [vmem:[%s5615_s6] ss:$8 sps:$4 sm:$0xff]   ;;  %s4852_s22 = smov 56   ;;  %s4853_s25 = smov 32   ;;  %vm951_vm5 = vcmask 1043456   ;;  %vm1986_vm6 = vcmask 523264  }
  0x1c   :  { %4365 = vmatprep.subr.mxu0 %v56_v16  ;;  %4375 = vmatpush3.bf16.msra.mxu1 %v4675_v41  ;;  %v4997_v51 = vsub.s32 0, %v4994_v50  ;;  %v37_v52 = vld [vmem:[%s5613_s4] sm:$0xf]  ;;  %v5004_v56 = vsub.s32 1, %v4994_v50  ;;  %s4854_s26 = smov 112   ;;  %s4855_s27 = smov 80  }
  0x1d   :  { %4366 = vmatpush3.msra.mxu0 %v56_v16  ;;  %4376 = vmatprep.subr.bf16.mxu1 %v4846_v42  ;;  %v5019_v1 = vld [vmem:[%s5614_s5] sm:$0xff]  ;;  %s4856_s2 = smov 72   ;;  %s4857_s3 = smov 104  }
  0x1e   :  { %4367 = vmatprep.subr.mxu0 %v55_v17  ;;  %v177_v55 = vrot.slane %v37_v52, %v4997_v51  ;;  %v183_v60 = vrot.slane %v37_v52, %v5004_v56  ;;  %v203_v2 = vrot.slane %v5019_v1, %v4997_v51  ;;  %v186_v11 = vld [vmem:[%s5610_s1] sm:$0x1]  ;;  %v187_v13 = vld [vmem:[%s5610_s1 + $0x1] sm:$0x1]  ;;  %s4849_s1 = smov 64   ;;  %s4858_s29 = smov 48  }
  0x1f   :  { %4368 = vmatpush3.msra.mxu0 %v55_v17  ;;  %v188_v12 = vcvt.s32.f32 %v186_v11  ;;  %v189_v15 = vcvt.s32.f32 %v187_v13  ;;  %s4859_s12 = smov 40  }
  0x20   :  { %4369 = vmatprep.subr.mxu0 %v54_v18  ;;  %4377 = vmatpush3.bf16.msra.mxu1 %v4676_v43 }
  0x21   :  { %4370 = vmatpush3.msra.mxu0 %v54_v18  ;;  %4382 = vmatprep.subr.mxu1 %v4846_v42  ;;  %v190_v14 = vsub.f32 1.0, %v188_v12  ;;  %v191_v17 = vsub.f32 1.0, %v189_v15 }
  0x22   :  { %4407 = vmatprep.subr.mxu0 %v4846_v42 }
  0x23   :  { %v192_v16 = vmul.f32 -10000.0, %v190_v14  ;;  %v193_v19 = vmul.f32 -10000.0, %v191_v17 }
  0x25   :  { %v5050_v18 = vrot.slane %v192_v16, %v4997_v51 }
  0x7d   :  { %v44_v21 = vpop.permute.xlu0 %43 }
  0x7e   :  { %vm48_vm0 = vcmp.eq.s32.totalorder %v44_v21, %v41_v20 }
  0x7f   :  { %4371 = vmatprep.mubr.msk.f32.mxu0 %vm48_vm0, %v4845_v22 }
  0x81   :  { %v47_v23 = vpop.permute.xlu0 %46 }
  0x82   :  { %vm49_vm1 = vcmp.eq.s32.totalorder %v47_v23, %v41_v20 }
  0x83   :  { %4372 = vmatmul.mubr.msk.f32.vlgmr.msra.gmra.mxu0 %vm49_vm1, %v4845_v22 }
  0x84   :  { %4409 = vmatprep.mubr.msk.f32.mxu0 %vm4847_vm3, %v4846_v42 }
 0x143   :  { %v4373_v24 = vpop.f32.mrf.mxu0 }
 0x144   :  { %v143_v28 = vadd.f32 %v4373_v24, %v70_v25  ;;  %v5054_v24 = vrot.slane %v193_v19, %v4997_v51 }
 0x145   :  { %v137_v26 = vpop.f32.mrf.mxu0 }
 0x146   :  { %v138_v27 = vadd.f32 %v137_v26, %v70_v25  ;;  %v150_v30 = vsel %vm146_vm2, %v143_v28, 0.0 }
 0x148   :  { %v147_v29 = vsel %vm146_vm2, %v138_v27, 0.0 }
 0x149   :  { %148 = vadd.xlane.f32.xlu1 %v147_v29 }
 0x14d   :  { %151 = vadd.xlane.f32.xlu1 %v150_v30 }
 0x1d2   :  { %v149_v31 = vpop.xlane.xlu1 %148 }
 0x1d3   :  { %v154_v32 = vmul.f32 0.03125, %v149_v31 }
 0x1d5   :  { %v156_v33 = vsub.f32 %v138_v27, %v154_v32 }
 0x1d6   :  { %v152_v34 = vpop.xlane.xlu1 %151 }
 0x1d7   :  { %v155_v35 = vmul.f32 0.03125, %v152_v34  ;;  %v158_v36 = vmul.f32 %v156_v33, %v156_v33 }
 0x1d9   :  { %v157_v37 = vsub.f32 %v143_v28, %v155_v35  ;;  %v160_v38 = vsel %vm146_vm2, %v158_v36, 0.0 }
 0x1da   :  { %161 = vadd.xlane.f32.xlu0 %v160_v38 }
 0x1db   :  { %v159_v39 = vmul.f32 %v157_v37, %v157_v37 }
 0x1dd   :  { %v163_v40 = vsel %vm146_vm2, %v159_v39, 0.0 }
 0x1de   :  { %164 = vadd.xlane.f32.xlu1 %v163_v40 }
 0x263   :  { %v162_v44 = vpop.xlane.xlu0 %161 }
 0x264   :  { %v166_v45 = vmul.f32 0.03125, %v162_v44 }
 0x266   :  { %v168_v46 = vadd.f32 1e-12, %v166_v45 }
 0x267   :  { %v165_v47 = vpop.xlane.xlu1 %164 }
 0x268   :  { %4703 = vrsqrt.f32 %v168_v46  ;;  %v167_v48 = vmul.f32 0.03125, %v165_v47 }
 0x26a   :  { %v169_v49 = vadd.f32 1e-12, %v167_v48 }
 0x26c   :  { %4705 = vrsqrt.f32 %v169_v49 }
 0x275   :  { %v4704_v53 = vpop.eup %4703 }
 0x276   :  { %v172_v54 = vmul.f32 %v4704_v53, %v156_v33 }
 0x278   :  { %v178_v59 = vmul.f32 %v177_v55, %v172_v54 }
 0x279   :  { %v4706_v57 = vpop.eup %4705 }
 0x27a   :  { %v173_v58 = vmul.f32 %v4706_v57, %v157_v37  ;;  %v5007_v62 = vadd.f32 %v183_v60, %v178_v59 }
 0x27c   :  { %v179_v61 = vmul.f32 %v177_v55, %v173_v58 }
 0x27e   :  { %v5009_v63 = vadd.f32 %v183_v60, %v179_v61 }
 0x280   :  { %v199_v0 = vpack.c.bf16 %v5009_v63, %v5007_v62 }
 0x282   :  { %4379 = vmatmul.mubr.msk.bf16.vlgmr.msra.gmra.mxu1 %vm146_vm2, %v199_v0 }
 0x283   :  { %4384 = vmatprep.mubr.msk.f32.mxu1 %vm4847_vm3, %v4846_v42 }
 0x342   :  { %v253_v3 = vpop.f32.mrf.mxu1 }
 0x343   :  { %v5023_v4 = vadd.f32 %v253_v3, %v203_v2 }
 0x344   :  { %v4380_v5 = vpop.f32.mrf.mxu1 }
 0x345   :  { %261 = vrot.lane.b32.xlu1 %v5023_v4, %s4848_s15 }
 0x346   :  { %v256_v6 = vpop.f32.mrf.mxu1 }
 0x347   :  { %v5027_v7 = vadd.f32 %v256_v6, %v203_v2 }
 0x348   :  { %v4381_v8 = vpop.f32.mrf.mxu1 }
 0x349   :  { %339 = vrot.lane.b32.xlu1 %v5027_v7, %s4848_s15 }
 0x3b7   :  { %v262_v9 = vpop.permute.xlu1 %261 }
 0x3b8   :  { %4383 = vmatpush3.xpose.msk.msra.mxu1 %vm263_vm4, %v262_v9 }
 0x3b9   :  { %4387 = vmatprep.subr.mxu1 %v4846_v42 }
 0x3bb   :  { %4385 = vmatmul.mubr.msk.f32.vlgmr.msra.gmra.mxu1 %vm263_vm4, %v5023_v4  ;;  %v340_v10 = vpop.permute.xlu1 %339 }
 0x3bc   :  { %4388 = vmatpush3.xpose.msk.msra.mxu1 %vm263_vm4, %v340_v10  ;;  %4389 = vmatprep.mubr.msk.f32.mxu1 %vm4847_vm3, %v4846_v42 }
 0x3bd   :  { %4392 = vmatprep.subr.mxu1 %v4846_v42 }
 0x3bf   :  { %4390 = vmatmul.mubr.msk.f32.vlgmr.msra.gmra.mxu1 %vm263_vm4, %v5027_v7 }
 0x3c0   :  { %4394 = vmatprep.mubr.msk.f32.mxu1 %vm4847_vm3, %v4846_v42 }
 0x47b   :  { %v334_v20 = vpop.f32.mrf.mxu1 }
 0x47c   :  { %v415_v21 = vmul.f32 0.35355338, %v334_v20 }
 0x47d   :  { %v4386_v22 = vpop.f32.mrf.mxu1 }
 0x47e   :  { %v429_v23 = vadd.f32 %v5050_v18, %v415_v21 }
 0x47f   :  { %v411_v25 = vpop.f32.mrf.mxu1 }
 0x480   :  { %v416_v26 = vmul.f32 0.35355338, %v411_v25  ;;  %v431_v27 = vsel %vm263_vm4, %v429_v23, -inf  ;;  %v4677_v25 = vld [vmem:[%s5615_s6] ss:$0 sps:$4 sm:$0xff]  }
 0x481   :  { %432 = vmax.xlane.f32.xlu1 %v431_v27  ;;  %v4391_v28 = vpop.f32.mrf.mxu1 }
 0x482   :  { %v430_v29 = vadd.f32 %v5054_v24, %v416_v26  ;;  %v4678_v26 = vld [vmem:[%s5615_s6 + $0x8] ss:$0 sps:$4 sm:$0xff]  }
 0x484   :  { %v434_v30 = vsel %vm263_vm4, %v430_v29, -inf }
 0x485   :  { %435 = vmax.xlane.f32.xlu0 %v434_v30 }
 0x492   :  { %529 = vrot.lane.b32.xlu1 %v5027_v7, %s4849_s1 }
 0x49b   :  { %453 = vrot.lane.b32.xlu0 %v5023_v4, %s4849_s1 }
 0x49f   :  { %609 = vrot.lane.b32.xlu0 %v5023_v4, %s4850_s20 }
 0x4a3   :  { %687 = vrot.lane.b32.xlu0 %v5027_v7, %s4850_s20 }
 0x50a   :  { %v433_v31 = vpop.xlane.xlu1 %432 }
 0x50b   :  { %v437_v32 = vsub.f32 %v429_v23, %v433_v31 }
 0x50d   :  { %v439_v33 = vmul.f32 1.442695, %v437_v32 }
 0x50e   :  { %v436_v34 = vpop.xlane.xlu0 %435  ;;  %v530_v53 = vpop.permute.xlu1 %529 }
 0x50f   :  { %4707 = vpow2.f32 %v439_v33  ;;  %v438_v35 = vsub.f32 %v430_v29, %v436_v34 }
 0x511   :  { %v441_v36 = vmul.f32 1.442695, %v438_v35 }
 0x512   :  { %v454_v37 = vpop.permute.xlu0 %453 }
 0x513   :  { %4709 = vpow2.f32 %v441_v36  ;;  %4393 = vmatpush3.msra.mxu1 %v454_v37 }
 0x514   :  { %4397 = vmatprep.subr.mxu1 %v4846_v42 }
 0x516   :  { %v610_v38 = vpop.permute.xlu0 %609 }
 0x51a   :  { %v688_v39 = vpop.permute.xlu0 %687 }
 0x51b   :  { %4408 = vmatpush3.xpose.msk.msra.mxu0 %vm263_vm4, %v688_v39 }
 0x51c   :  { %v4708_v40 = vpop.eup %4707  ;;  %4417 = vmatprep.subr.mxu0 %v4846_v42 }
 0x51d   :  { %v443_v41 = vsel %vm263_vm4, %v4708_v40, 0.0 }
 0x51e   :  { %444 = vadd.xlane.f32.xlu0 %v443_v41 }
 0x520   :  { %v4710_v43 = vpop.eup %4709 }
 0x521   :  { %v446_v44 = vsel %vm263_vm4, %v4710_v43, 0.0 }
 0x522   :  { %447 = vadd.xlane.f32.xlu0 %v446_v44 }
 0x538   :  { %607 = vrot.lane.b32.xlu0 %v5023_v4, %s4851_s21 }
 0x53c   :  { %685 = vrot.lane.b32.xlu0 %v5027_v7, %s4851_s21 }
 0x5a7   :  { %v445_v45 = vpop.xlane.xlu0 %444 }
 0x5a8   :  { %4711 = vrcp.f32 %v445_v45 }
 0x5ab   :  { %v448_v46 = vpop.xlane.xlu0 %447 }
 0x5ac   :  { %4713 = vrcp.f32 %v448_v46 }
 0x5af   :  { %v608_v47 = vpop.permute.xlu0 %607 }
 0x5b3   :  { %v686_v48 = vpop.permute.xlu0 %685 }
 0x5b4   :  { %4410 = vmatmul.mubr.msk.f32.vlgmr.msra.gmra.mxu0 %vm263_vm4, %v686_v48 }
 0x5b5   :  { %v4712_v49 = vpop.eup %4711  ;;  %4419 = vmatprep.mubr.msk.f32.mxu0 %vm4847_vm3, %v4846_v42 }
 0x5b6   :  { %v451_v52 = vmul.f32 %v4712_v49, %v4708_v40 }
 0x5b8   :  { %4395 = vmatmul.mubr.msk.f32.vlgmr.msra.gmra.mxu1 %vm263_vm4, %v451_v52 }
 0x5b9   :  { %v4714_v54 = vpop.eup %4713  ;;  %4398 = vmatpush3.msra.mxu1 %v530_v53  ;;  %4399 = vmatprep.mubr.msk.f32.mxu1 %vm4847_vm3, %v4846_v42 }
 0x5ba   :  { %4402 = vmatprep.subr.mxu1 %v4846_v42  ;;  %v452_v55 = vmul.f32 %v4714_v54, %v4710_v43 }
 0x5bc   :  { %4400 = vmatmul.mubr.msk.f32.vlgmr.msra.gmra.mxu1 %vm263_vm4, %v452_v55 }
 0x5bd   :  { %4403 = vmatpush3.xpose.msk.msra.mxu1 %vm263_vm4, %v610_v38  ;;  %4404 = vmatprep.mubr.msk.f32.mxu1 %vm4847_vm3, %v4846_v42 }
 0x5be   :  { %4412 = vmatprep.subr.mxu1 %v4846_v42 }
 0x5c0   :  { %4405 = vmatmul.mubr.msk.f32.vlgmr.msra.gmra.mxu1 %vm263_vm4, %v608_v47 }
 0x5c1   :  { %4414 = vmatprep.mubr.msk.f32.mxu1 %vm4847_vm3, %v4846_v42 }
 0x674   :  { %v759_v57 = vpop.f32.mrf.mxu0 }
 0x675   :  { %v764_v58 = vmul.f32 0.35355338, %v759_v57 }
 0x676   :  { %v4411_v59 = vpop.f32.mrf.mxu0 }
 0x677   :  { %v766_v60 = vadd.f32 %v764_v58, %v5054_v24 }
 0x678   :  { %v525_v61 = vpop.f32.mrf.mxu1 }
 0x679   :  { %v770_v0 = vsel %vm263_vm4, %v766_v60, -inf }
 0x67a   :  { %771 = vmax.xlane.f32.xlu0 %v770_v0  ;;  %v4396_v2 = vpop.f32.mrf.mxu1 }
 0x67c   :  { %v601_v3 = vpop.f32.mrf.mxu1 }
 0x67d   :  { %v606_v5 = vpack.c.bf16 %v601_v3, %v525_v61 }
 0x67e   :  { %v4401_v6 = vpop.f32.mrf.mxu1 }
 0x680   :  { %v681_v8 = vpop.f32.mrf.mxu1 }
 0x681   :  { %v763_v9 = vmul.f32 0.35355338, %v681_v8 }
 0x682   :  { %v4406_v10 = vpop.f32.mrf.mxu1 }
 0x683   :  { %v765_v11 = vadd.f32 %v763_v9, %v5050_v18 }
 0x685   :  { %v767_v12 = vsel %vm263_vm4, %v765_v11, -inf }
 0x686   :  { %768 = vmax.xlane.f32.xlu1 %v767_v12 }
 0x703   :  { %v772_v13 = vpop.xlane.xlu0 %771 }
 0x704   :  { %v774_v14 = vsub.f32 %v766_v60, %v772_v13 }
 0x706   :  { %v777_v15 = vmul.f32 1.442695, %v774_v14 }
 0x708   :  { %4715 = vpow2.f32 %v777_v15 }
 0x70f   :  { %v769_v16 = vpop.xlane.xlu1 %768 }
 0x710   :  { %v773_v17 = vsub.f32 %v765_v11, %v769_v16  ;;  %v4679_v16 = vld [vmem:[%s5615_s6 + $0x10] ss:$0 sps:$4 sm:$0xff]  }
 0x712   :  { %v775_v19 = vmul.f32 1.442695, %v773_v17 }
 0x714   :  { %4717 = vpow2.f32 %v775_v19 }
 0x715   :  { %v4716_v20 = vpop.eup %4715 }
 0x716   :  { %v782_v21 = vsel %vm263_vm4, %v4716_v20, 0.0 }
 0x717   :  { %783 = vadd.xlane.f32.xlu1 %v782_v21 }
 0x721   :  { %v4718_v22 = vpop.eup %4717 }
 0x722   :  { %v779_v23 = vsel %vm263_vm4, %v4718_v22, 0.0 }
 0x723   :  { %780 = vadd.xlane.f32.xlu0 %v779_v23 }
 0x728   :  { %865 = vrot.lane.b32.xlu1 %v5027_v7, %s4852_s22 }
 0x72c   :  { %999 = vrot.lane.b32.xlu1 %v4677_v25, %s4853_s25 }
 0x730   :  { %1126 = vrot.lane.b32.xlu1 %v5027_v7, %s4854_s26 }
 0x734   :  { %1050 = vrot.lane.b32.xlu1 %v5023_v4, %s4855_s27 }
 0x739   :  { %789 = vrot.lane.b32.xlu0 %v5023_v4, %s4852_s22 }
 0x73d   :  { %1128 = vrot.lane.b32.xlu0 %v5027_v7, %s4855_s27 }
 0x741   :  { %946 = vrot.lane.b32.xlu0 %v4678_v26, %s4853_s25 }
 0x745   :  { %1048 = vrot.lane.b32.xlu0 %v5023_v4, %s4854_s26 }
 0x7a0   :  { %v784_v27 = vpop.xlane.xlu1 %783 }
 0x7a1   :  { %4719 = vrcp.f32 %v784_v27 }
 0x7a4   :  { %v866_v28 = vpop.permute.xlu1 %865 }
 0x7a5   :  { %4418 = vmatpush3.msra.mxu0 %v866_v28 }
 0x7a6   :  { %4428 = vmatprep.subr.bf16.mxu0 %v4846_v42 }
 0x7a8   :  { %v1000_v31 = vpop.permute.xlu1 %999 }
 0x7a9   :  { %v1005_v32 = vsel %vm951_vm5, %v1000_v31, 0 }
 0x7ac   :  { %v781_v29 = vpop.xlane.xlu0 %780  ;;  %v1127_v40 = vpop.permute.xlu1 %1126 }
 0x7ad   :  { %4721 = vrcp.f32 %v781_v29 }
 0x7ae   :  { %v4720_v30 = vpop.eup %4719 }
 0x7af   :  { %v788_v33 = vmul.f32 %v4720_v30, %v4716_v20 }
 0x7b0   :  { %v790_v34 = vpop.permute.xlu0 %789  ;;  %v1051_v57 = vpop.permute.xlu1 %1050 }
 0x7b1   :  { %4413 = vmatpush3.msra.mxu1 %v790_v34  ;;  %4420 = vmatmul.mubr.msk.f32.vlgmr.msra.gmra.mxu0 %vm263_vm4, %v788_v33 }
 0x7b2   :  { %4429 = vmatpush3.bf16.msra.mxu0 %v1005_v32  ;;  %4430 = vmatprep.mubr.msk.bf16.mxu0 %vm4847_vm3, %v4846_v42 }
 0x7b3   :  { %4439 = vmatprep.subr.mxu0 %v4846_v42  ;;  %4422 = vmatprep.subr.bf16.mxu1 %v4846_v42 }
 0x7b4   :  { %v1129_v35 = vpop.permute.xlu0 %1128 }
 0x7b5   :  { %4431 = vmatmul.mubr.msk.bf16.vlgmr.msra.gmra.mxu0 %vm263_vm4, %v606_v5 }
 0x7b6   :  { %4440 = vmatpush3.xpose.msk.msra.mxu0 %vm263_vm4, %v1129_v35  ;;  %4441 = vmatprep.mubr.msk.f32.mxu0 %vm4847_vm3, %v4846_v42 }
 0x7b7   :  { %4449 = vmatprep.subr.mxu0 %v4846_v42 }
 0x7b8   :  { %v947_v37 = vpop.permute.xlu0 %946 }
 0x7b9   :  { %v953_v38 = vsel %vm951_vm5, %v947_v37, 0 }
 0x7ba   :  { %v4722_v36 = vpop.eup %4721 }
 0x7bb   :  { %v787_v39 = vmul.f32 %v4722_v36, %v4718_v22 }
 0x7bc   :  { %v1049_v60 = vpop.permute.xlu0 %1048 }
 0x7bd   :  { %4415 = vmatmul.mubr.msk.f32.vlgmr.msra.gmra.mxu1 %vm263_vm4, %v787_v39  ;;  %4442 = vmatmul.mubr.msk.f32.vlgmr.msra.gmra.mxu0 %vm263_vm4, %v1127_v40 }
 0x7be   :  { %4423 = vmatpush3.bf16.msra.mxu1 %v953_v38  ;;  %4424 = vmatprep.mubr.msk.bf16.mxu1 %vm4847_vm3, %v4846_v42 }
 0x7bf   :  { %4434 = vmatprep.subr.mxu1 %v4846_v42  ;;  %4451 = vmatprep.mubr.msk.f32.mxu0 %vm4847_vm3, %v4846_v42 }
 0x871   :  { %v937_v41 = vpop.f32.mrf.mxu0 }
 0x873   :  { %v4421_v43 = vpop.f32.mrf.mxu0 }
 0x875   :  { %v5137_v44 = vpop.f32.mrf.mxu0 }
 0x877   :  { %v4432_v45 = vpop.f32.mrf.mxu0 }
 0x879   :  { %v5139_v46 = vpop.f32.mrf.mxu0 }
 0x87b   :  { %v4433_v47 = vpop.f32.mrf.mxu0 }
 0x87d   :  { %v861_v48 = vpop.f32.mrf.mxu1  ;;  %v1200_v49 = vpop.f32.mrf.mxu0 }
 0x87e   :  { %v942_v52 = vpack.c.bf16 %v937_v41, %v861_v48  ;;  %v1205_v53 = vmul.f32 0.35355338, %v1200_v49 }
 0x87f   :  { %v4416_v54 = vpop.f32.mrf.mxu1  ;;  %v4443_v55 = vpop.f32.mrf.mxu0 }
 0x880   :  { %4425 = vmatmul.mubr.msk.bf16.vlgmr.msra.gmra.mxu1 %vm263_vm4, %v942_v52  ;;  %v1207_v58 = vadd.f32 %v1205_v53, %v5054_v24 }
 0x881   :  { %4435 = vmatpush3.xpose.msk.msra.mxu1 %vm263_vm4, %v1051_v57  ;;  %4436 = vmatprep.mubr.msk.f32.mxu1 %vm4847_vm3, %v4846_v42 }
 0x882   :  { %v1211_v59 = vsel %vm263_vm4, %v1207_v58, -inf  ;;  %4444 = vmatprep.subr.mxu1 %v4846_v42 }
 0x883   :  { %1212 = vmax.xlane.f32.xlu1 %v1211_v59 }
 0x888   :  { %4437 = vmatmul.mubr.msk.f32.vlgmr.msra.gmra.mxu1 %vm263_vm4, %v1049_v60 }
 0x889   :  { %4446 = vmatprep.mubr.msk.f32.mxu1 %vm4847_vm3, %v4846_v42 }
 0x894   :  { %1440 = vrot.lane.b32.xlu1 %v5023_v4, %s4856_s2 }
 0x898   :  { %1438 = vrot.lane.b32.xlu1 %v5023_v4, %s4857_s3 }
 0x89c   :  { %1516 = vrot.lane.b32.xlu1 %v5027_v7, %s4857_s3 }
 0x90c   :  { %v1213_v61 = vpop.xlane.xlu1 %1212 }
 0x90d   :  { %v1215_v0 = vsub.f32 %v1207_v58, %v1213_v61 }
 0x90f   :  { %v1218_v2 = vmul.f32 1.442695, %v1215_v0 }
 0x910   :  { %v1441_v20 = vpop.permute.xlu1 %1440 }
 0x911   :  { %4723 = vpow2.f32 %v1218_v2 }
 0x914   :  { %v1439_v23 = vpop.permute.xlu1 %1438 }
 0x918   :  { %v1517_v25 = vpop.permute.xlu1 %1516 }
 0x91e   :  { %v4724_v3 = vpop.eup %4723 }
 0x91f   :  { %v1223_v5 = vsel %vm263_vm4, %v4724_v3, 0.0 }
 0x920   :  { %1224 = vadd.xlane.f32.xlu0 %v1223_v5 }
 0x936   :  { %1306 = vrot.lane.b32.xlu0 %v5027_v7, %s4858_s29 }
 0x93a   :  { %1518 = vrot.lane.b32.xlu0 %v5027_v7, %s4856_s2 }
 0x940   :  { %v5162_v6 = vpop.f32.mrf.mxu1 }
 0x942   :  { %v4426_v8 = vpop.f32.mrf.mxu1 }
 0x943   :  { %v4680_v8 = vld [vmem:[%s5615_s6 + $0x18] ss:$0 sps:$4 sm:$0xff]  }
 0x944   :  { %v5164_v9 = vpop.f32.mrf.mxu1 }
 0x946   :  { %v4427_v10 = vpop.f32.mrf.mxu1 }
 0x948   :  { %v1122_v11 = vpop.f32.mrf.mxu1 }
 0x949   :  { %v1204_v13 = vmul.f32 0.35355338, %v1122_v11 }
 0x94a   :  { %v4438_v12 = vpop.f32.mrf.mxu1 }
 0x94b   :  { %v1206_v14 = vadd.f32 %v1204_v13, %v5050_v18 }
 0x94d   :  { %v1208_v15 = vsel %vm263_vm4, %v1206_v14, -inf }
 0x959   :  { %1209 = vmax.xlane.f32.xlu0 %v1208_v15 }
 0x96f   :  { %1230 = vrot.lane.b32.xlu0 %v5023_v4, %s4858_s29 }
 0x973   :  { %1387 = vrot.lane.b32.xlu0 %v4679_v16, %s4853_s25 }
 0x977   :  { %1696 = vrot.lane.b32.xlu0 %v5027_v7, %s4859_s12 }
 0x97b   :  { %1777 = vrot.lane.b32.xlu0 %v4680_v8, %s4853_s25  ;;  %v1864_v8 = vsub.s32 2, %v4994_v50 }
 0x9a9   :  { %v1225_v17 = vpop.xlane.xlu0 %1224 }
 0x9aa   :  { %4725 = vrcp.f32 %v1225_v17 }
 0x9ad   :  { %v1307_v19 = vpop.permute.xlu0 %1306 }
 0x9ae   :  { %4450 = vmatpush3.msra.mxu0 %v1307_v19 }
 0x9af   :  { %4460 = vmatprep.subr.mxu0 %v4846_v42 }
 0x9b1   :  { %v1519_v7 = vpop.permute.xlu0 %1518 }
 0x9b7   :  { %v4726_v21 = vpop.eup %4725 }
 0x9b8   :  { %v1229_v22 = vmul.f32 %v4726_v21, %v4724_v3 }
 0x9ba   :  { %4452 = vmatmul.mubr.msk.f32.vlgmr.msra.gmra.mxu0 %vm263_vm4, %v1229_v22  ;;  %v1042_v22 = vadd.f32 %v5137_v44, %v5162_v6  ;;  %v1831_v44 = vrot.slane %v5019_v1, %v5004_v56 }
 0x9bb   :  { %4461 = vmatpush3.xpose.msk.msra.mxu0 %vm263_vm4, %v1441_v20  ;;  %4462 = vmatprep.mubr.msk.f32.mxu0 %vm4847_vm3, %v4846_v42 }
 0x9bc   :  { %4465 = vmatprep.subr.mxu0 %v4846_v42 }
 0x9be   :  { %4463 = vmatmul.mubr.msk.f32.vlgmr.msra.gmra.mxu0 %vm263_vm4, %v1439_v23 }
 0x9bf   :  { %4466 = vmatpush3.xpose.msk.msra.mxu0 %vm263_vm4, %v1519_v7  ;;  %4467 = vmatprep.mubr.msk.f32.mxu0 %vm4847_vm3, %v4846_v42 }
 0x9c0   :  { %4475 = vmatprep.subr.mxu0 %v4846_v42 }
 0x9c2   :  { %4468 = vmatmul.mubr.msk.f32.vlgmr.msra.gmra.mxu0 %vm263_vm4, %v1517_v25 }
 0x9c3   :  { %4477 = vmatprep.mubr.msk.f32.mxu0 %vm4847_vm3, %v4846_v42 }
 0x9e2   :  { %v1210_v26 = vpop.xlane.xlu0 %1209 }
 0x9e3   :  { %v1214_v27 = vsub.f32 %v1206_v14, %v1210_v26  ;;  %v1045_v26 = vadd.f32 %v5139_v46, %v5164_v9 }
 0x9e5   :  { %v1216_v28 = vmul.f32 1.442695, %v1214_v27 }
 0x9e6   :  { %v1231_v29 = vpop.permute.xlu0 %1230 }
 0x9e7   :  { %4727 = vpow2.f32 %v1216_v28  ;;  %4445 = vmatpush3.msra.mxu1 %v1231_v29 }
 0x9e8   :  { %4454 = vmatprep.subr.bf16.mxu1 %v4846_v42 }
 0x9ea   :  { %v1388_v30 = vpop.permute.xlu0 %1387 }
 0x9eb   :  { %v1393_v53 = vsel %vm951_vm5, %v1388_v30, 0 }
 0x9ee   :  { %v1697_v31 = vpop.permute.xlu0 %1696 }
 0x9ef   :  { %4476 = vmatpush3.msra.mxu0 %v1697_v31 }
 0x9f0   :  { %4486 = vmatprep.subr.bf16.mxu0 %v4846_v42 }
 0x9f2   :  { %v1778_v20 = vpop.permute.xlu0 %1777 }
 0x9f3   :  { %v1783_v21 = vsel %vm951_vm5, %v1778_v20, 0 }
 0x9f4   :  { %v4728_v32 = vpop.eup %4727 }
 0x9f5   :  { %v1220_v33 = vsel %vm263_vm4, %v4728_v32, 0.0 }
 0x9f6   :  { %1221 = vadd.xlane.f32.xlu1 %v1220_v33 }
 0xa7a   :  { %v1378_v34 = vpop.f32.mrf.mxu0 }
 0xa7c   :  { %v4453_v35 = vpop.f32.mrf.mxu0 }
 0xa7e   :  { %v1512_v36 = vpop.f32.mrf.mxu0 }
 0xa7f   :  { %v1594_v37 = vmul.f32 0.35355338, %v1512_v36  ;;  %v1222_v38 = vpop.xlane.xlu1 %1221 }
 0xa80   :  { %4729 = vrcp.f32 %v1222_v38  ;;  %v4464_v39 = vpop.f32.mrf.mxu0 }
 0xa81   :  { %v1596_v40 = vadd.f32 %v1594_v37, %v5050_v18 }
 0xa82   :  { %v1590_v41 = vpop.f32.mrf.mxu0 }
 0xa83   :  { %v1595_v43 = vmul.f32 0.35355338, %v1590_v41  ;;  %v1598_v45 = vsel %vm263_vm4, %v1596_v40, -inf }
 0xa84   :  { %v4469_v47 = vpop.f32.mrf.mxu0  ;;  %1599 = vmax.xlane.f32.xlu1 %v1598_v45 }
 0xa85   :  { %v1597_v48 = vadd.f32 %v1595_v43, %v5054_v24 }
 0xa87   :  { %v1601_v49 = vsel %vm263_vm4, %v1597_v48, -inf }
 0xa88   :  { %1602 = vmax.xlane.f32.xlu1 %v1601_v49 }
 0xa8d   :  { %v4730_v52 = vpop.eup %4729 }
 0xa8e   :  { %v1228_v54 = vmul.f32 %v4730_v52, %v4728_v32 }
 0xa90   :  { %4447 = vmatmul.mubr.msk.f32.vlgmr.msra.gmra.mxu1 %vm263_vm4, %v1228_v54 }
 0xa91   :  { %4455 = vmatpush3.bf16.msra.mxu1 %v1393_v53  ;;  %4456 = vmatprep.mubr.msk.bf16.mxu1 %vm4847_vm3, %v4846_v42 }
 0xa92   :  { %4470 = vmatprep.subr.mxu1 %v4846_v42 }
 0xb0d   :  { %v1600_v55 = vpop.xlane.xlu1 %1599 }
 0xb0e   :  { %v1604_v57 = vsub.f32 %v1596_v40, %v1600_v55 }
 0xb10   :  { %v1606_v58 = vmul.f32 1.442695, %v1604_v57 }
 0xb11   :  { %v1603_v59 = vpop.xlane.xlu1 %1602 }
 0xb12   :  { %4731 = vpow2.f32 %v1606_v58  ;;  %v1605_v60 = vsub.f32 %v1597_v48, %v1603_v59  ;;  %v4682_v59 = vld [vmem:[%s5615_s6 + $0x4] ss:$8 sps:$4 sm:$0xff]  }
 0xb14   :  { %v1608_v61 = vmul.f32 1.442695, %v1605_v60 }
 0xb16   :  { %4733 = vpow2.f32 %v1608_v61 }
 0xb1f   :  { %v4732_v0 = vpop.eup %4731 }
 0xb20   :  { %v1610_v2 = vsel %vm263_vm4, %v4732_v0, 0.0 }
 0xb21   :  { %1611 = vadd.xlane.f32.xlu1 %v1610_v2 }
 0xb23   :  { %v4734_v3 = vpop.eup %4733 }
 0xb24   :  { %v1613_v5 = vsel %vm263_vm4, %v4734_v3, 0.0 }
 0xb25   :  { %1614 = vadd.xlane.f32.xlu1 %v1613_v5 }
 0xb36   :  { %1620 = vrot.lane.b32.xlu1 %v5023_v4, %s4859_s12 }
 0xb50   :  { %v1302_v10 = vpop.f32.mrf.mxu1 }
 0xb51   :  { %v1383_v11 = vpack.c.bf16 %v1378_v34, %v1302_v10 }
 0xb52   :  { %v4448_v12 = vpop.f32.mrf.mxu1 }
 0xb53   :  { %4457 = vmatmul.mubr.msk.bf16.vlgmr.msra.gmra.mxu1 %vm263_vm4, %v1383_v11  ;;  %v1865_v12 = vrot.slane %v5019_v1, %v1864_v8 }
 0xb54   :  { %4472 = vmatprep.mubr.msk.f32.mxu1 %vm4847_vm3, %v4846_v42 }
 0xbaa   :  { %v1612_v13 = vpop.xlane.xlu1 %1611 }
 0xbab   :  { %4735 = vrcp.f32 %v1612_v13  ;;  %v1870_v13 = vsub.s32 3, %v4994_v50 }
 0xbae   :  { %v1615_v14 = vpop.xlane.xlu1 %1614 }
 0xbaf   :  { %4737 = vrcp.f32 %v1615_v14 }
 0xbb2   :  { %v1621_v15 = vpop.permute.xlu1 %1620 }
 0xbb3   :  { %4471 = vmatpush3.msra.mxu1 %v1621_v15 }
 0xbb4   :  { %4480 = vmatprep.subr.bf16.mxu1 %v4846_v42 }
 0xbb8   :  { %v4736_v4 = vpop.eup %4735 }
 0xbb9   :  { %v1618_v16 = vmul.f32 %v4736_v4, %v4732_v0 }
 0xbbb   :  { %4473 = vmatmul.mubr.msk.f32.vlgmr.msra.gmra.mxu1 %vm263_vm4, %v1618_v16  ;;  %v1871_v16 = vrot.slane %v5019_v1, %v1870_v13 }
 0xbbc   :  { %v4738_v17 = vpop.eup %4737  ;;  %4482 = vmatprep.mubr.msk.bf16.mxu1 %vm4847_vm3, %v4846_v42  ;;  %4481 = vmatpush3.bf16.msra.mxu1 %v1783_v21 }
 0xbbd   :  { %v1619_v19 = vmul.f32 %v4738_v17, %v4734_v3  ;;  %4494 = vmatprep.subr.bf16.mxu1 %v4846_v42 }
 0xbbf   :  { %4478 = vmatmul.mubr.msk.f32.vlgmr.msra.gmra.mxu0 %vm263_vm4, %v1619_v19 }
 0xbc0   :  { %4490 = vmatprep.mubr.msk.bf16.mxu0 %vm4847_vm3, %v4846_v42 }
 0xc13   :  { %v1429_v23 = vpop.f32.mrf.mxu1 }
 0xc14   :  { %v1436_v7 = vadd.f32 %v1429_v23, %v1042_v22  ;;  %v4683_v22 = vld [vmem:[%s5616_s7 + $0x18] sm:$0xff]   ;;  %v4684_v23 = vld [vmem:[%s5616_s7 + $0x10] sm:$0xff]  }
 0xc15   :  { %v4458_v25 = vpop.f32.mrf.mxu1 }
 0xc16   :  { %v4686_v25 = vld [vmem:[%s5616_s7] sm:$0xff]  }
 0xc17   :  { %v1432_v27 = vpop.f32.mrf.mxu1 }
 0xc18   :  { %v1437_v28 = vadd.f32 %v1432_v27, %v1045_v26  ;;  %v1881_v26 = vsub.s32 4, %v4994_v50 }
 0xc19   :  { %v4459_v29 = vpop.f32.mrf.mxu1 }
 0xc1a   :  { %v1882_v27 = vrot.slane %v5019_v1, %v1881_v26 }
 0xc7b   :  { %v1692_v30 = vpop.f32.mrf.mxu1 }
 0xc7d   :  { %v4474_v31 = vpop.f32.mrf.mxu1 }
 0xc7f   :  { %v1768_v32 = vpop.f32.mrf.mxu0 }
 0xc80   :  { %v1773_v33 = vpack.c.bf16 %v1768_v32, %v1692_v30 }
 0xc81   :  { %v4479_v34 = vpop.f32.mrf.mxu0 }
 0xc82   :  { %4483 = vmatmul.mubr.msk.bf16.vlgmr.msra.gmra.mxu1 %vm263_vm4, %v1773_v33 }
 0xc83   :  { %4502 = vmatprep.mubr.msk.bf16.mxu1 %vm4847_vm3, %v4846_v42  ;;  %4495 = vmatpush3.bf16.msra.mxu1 %v4683_v22 }
 0xc84   :  { %4496 = vmatprep.subr.bf16.mxu1 %v4846_v42 }
 0xc87   :  { %4497 = vmatpush3.bf16.msra.mxu1 %v4684_v23 }
 0xc88   :  { %4498 = vmatprep.subr.bf16.mxu1 %v4846_v42 }
 0xd42   :  { %v1819_v6 = vpop.f32.mrf.mxu1 }
 0xd43   :  { %v1826_v35 = vadd.f32 %v1819_v6, %v1436_v7  ;;  %v4685_v7 = vld [vmem:[%s5616_s7 + $0x8] sm:$0xff]  }
 0xd44   :  { %v4484_v36 = vpop.f32.mrf.mxu1  ;;  %4499 = vmatpush3.bf16.msra.mxu1 %v4685_v7  ;;  %v2067_v7 = vsub.s32 7, %v4994_v50 }
 0xd45   :  { %v1832_v46 = vadd.f32 %v1831_v44, %v1826_v35  ;;  %4500 = vmatprep.subr.bf16.mxu1 %v4846_v42 }
 0xd46   :  { %v1822_v9 = vpop.f32.mrf.mxu1 }
 0xd47   :  { %v1827_v37 = vadd.f32 %v1822_v9, %v1437_v28  ;;  %v1834_v38 = vadd.f32 %v1832_v46, %v5007_v62 }
 0xd48   :  { %v4485_v39 = vpop.f32.mrf.mxu1  ;;  %4501 = vmatpush3.bf16.msra.mxu1 %v4686_v25 }
 0xd49   :  { %v1833_v40 = vadd.f32 %v1831_v44, %v1827_v37  ;;  %v1836_v41 = vsel %vm146_vm2, %v1834_v38, 0.0  ;;  %4519 = vmatprep.subr.mxu1 %v4846_v42 }
 0xd4a   :  { %1837 = vadd.xlane.f32.xlu0 %v1836_v41  ;;  %v1960_v41 = vsub.s32 5, %v4994_v50 }
 0xd4b   :  { %v1835_v43 = vadd.f32 %v1833_v40, %v5009_v63  ;;  %v4681_v63 = vld [vmem:[%s5615_s6 + $0x14] ss:$8 sps:$4 sm:$0xff]  }
 0xd4c   :  { %4487 = vmatpush3.bf16.msra.mxu0 %v4681_v63 }
 0xd4d   :  { %v1839_v45 = vsel %vm146_vm2, %v1835_v43, 0.0  ;;  %4488 = vmatprep.subr.bf16.mxu0 %v4846_v42 }
 0xd4e   :  { %1840 = vadd.xlane.f32.xlu1 %v1839_v45 }
 0xd50   :  { %4489 = vmatpush3.bf16.msra.mxu0 %v4682_v59 }
 0xd51   :  { %4506 = vmatprep.subr.bf16.mxu0 %v4846_v42 }
 0xdd3   :  { %v1838_v47 = vpop.xlane.xlu0 %1837 }
 0xdd4   :  { %v1842_v48 = vmul.f32 0.03125, %v1838_v47 }
 0xdd6   :  { %v1844_v49 = vsub.f32 %v1834_v38, %v1842_v48 }
 0xdd7   :  { %v1841_v52 = vpop.xlane.xlu1 %1840 }
 0xdd8   :  { %v1843_v53 = vmul.f32 0.03125, %v1841_v52  ;;  %v1846_v54 = vmul.f32 %v1844_v49, %v1844_v49 }
 0xdda   :  { %v1845_v55 = vsub.f32 %v1835_v43, %v1843_v53  ;;  %v1848_v57 = vsel %vm146_vm2, %v1846_v54, 0.0  ;;  %v1961_v43 = vrot.slane %v5019_v1, %v1960_v41 }
 0xddb   :  { %1849 = vadd.xlane.f32.xlu0 %v1848_v57 }
 0xddc   :  { %v1847_v62 = vmul.f32 %v1845_v55, %v1845_v55 }
 0xdde   :  { %v1851_v58 = vsel %vm146_vm2, %v1847_v62, 0.0 }
 0xddf   :  { %1852 = vadd.xlane.f32.xlu0 %v1851_v58 }
 0xe64   :  { %v1850_v60 = vpop.xlane.xlu0 %1849 }
 0xe65   :  { %v1854_v61 = vmul.f32 0.03125, %v1850_v60 }
 0xe67   :  { %v1856_v0 = vadd.f32 1e-12, %v1854_v61 }
 0xe68   :  { %v1853_v2 = vpop.xlane.xlu0 %1852 }
 0xe69   :  { %4739 = vrsqrt.f32 %v1856_v0  ;;  %v1855_v3 = vmul.f32 0.03125, %v1853_v2 }
 0xe6b   :  { %v1857_v5 = vadd.f32 1e-12, %v1855_v3 }
 0xe6d   :  { %4741 = vrsqrt.f32 %v1857_v5 }
 0xe76   :  { %v4740_v10 = vpop.eup %4739 }
 0xe77   :  { %v1860_v11 = vmul.f32 %v4740_v10, %v1844_v49 }
 0xe79   :  { %v1866_v4 = vmul.f32 %v1865_v12, %v1860_v11  ;;  %v4687_v11 = vld [vmem:[%s5615_s6 + $0x30] ss:$8 sps:$4 sm:$0xff]  }
 0xe7a   :  { %v4742_v14 = vpop.eup %4741 }
 0xe7b   :  { %v1861_v15 = vmul.f32 %v4742_v14, %v1845_v55  ;;  %v1872_v19 = vadd.f32 %v1871_v16, %v1866_v4 }
 0xe7d   :  { %v1867_v17 = vmul.f32 %v1865_v12, %v1861_v15  ;;  %v4688_v12 = vld [vmem:[%s5615_s6 + $0x20] ss:$8 sps:$4 sm:$0xff]  }
 0xe7f   :  { %v1873_v20 = vadd.f32 %v1871_v16, %v1867_v17 }
 0xe81   :  { %v1878_v21 = vpack.c.bf16 %v1873_v20, %v1872_v19 }
 0xe83   :  { %4491 = vmatmul.mubr.msk.bf16.vlgmr.msra.gmra.mxu0 %vm146_vm2, %v1878_v21 }
 0xe84   :  { %4510 = vmatprep.mubr.msk.bf16.mxu0 %vm4847_vm3, %v4846_v42  ;;  %4507 = vmatpush3.bf16.msra.mxu0 %v4687_v11 }
 0xe85   :  { %4508 = vmatprep.subr.bf16.mxu0 %v4846_v42 }
 0xe88   :  { %4509 = vmatpush3.bf16.msra.mxu0 %v4688_v12 }
 0xe89   :  { %4514 = vmatprep.subr.mxu0 %v4846_v42 }
 0xf43   :  { %v1932_v28 = vpop.f32.mrf.mxu0 }
 0xf44   :  { %v1933_v29 = vadd.f32 %v1932_v28, %v1882_v27 }
 0xf45   :  { %v4492_v30 = vpop.f32.mrf.mxu0 }
 0xf46   :  { %v1941_v31 = vmul.f32 0.70710677, %v1933_v29  ;;  %v1939_v46 = vmul.f32 0.5, %v1933_v29  ;;  %v2068_v29 = vrot.slane %v5019_v1, %v2067_v7 }
 0xf47   :  { %v1935_v32 = vpop.f32.mrf.mxu0 }
 0xf48   :  { %4743 = verf.f32 %v1941_v31  ;;  %v1936_v33 = vadd.f32 %v1935_v32, %v1882_v27 }
 0xf49   :  { %v4493_v34 = vpop.f32.mrf.mxu0 }
 0xf4a   :  { %v1942_v44 = vmul.f32 0.70710677, %v1936_v33  ;;  %v1940_v9 = vmul.f32 0.5, %v1936_v33  ;;  %v5315_v34 = vld [vmem:[%s5614_s5 + $0x8] sm:$0xff] }
 0xf4c   :  { %4745 = verf.f32 %v1942_v44 }
 0xf55   :  { %v4744_v6 = vpop.eup %4743 }
 0xf56   :  { %v1945_v35 = vadd.f32 1.0, %v4744_v6 }
 0xf58   :  { %v1947_v38 = vmul.f32 %v1945_v35, %v1939_v46 }
 0xf59   :  { %v4746_v36 = vpop.eup %4745 }
 0xf5a   :  { %v1946_v37 = vadd.f32 1.0, %v4746_v36 }
 0xf5c   :  { %v1948_v39 = vmul.f32 %v1946_v37, %v1940_v9 }
 0xf5e   :  { %v1957_v40 = vpack.c.bf16 %v1948_v39, %v1947_v38 }
 0xf60   :  { %4503 = vmatmul.mubr.msk.bf16.vlgmr.msra.gmra.mxu1 %vm1986_vm6, %v1957_v40 }
 0xf61   :  { %4521 = vmatprep.mubr.msk.f32.mxu1 %vm4847_vm3, %v4846_v42 }
0x1020   :  { %v2024_v45 = vpop.f32.mrf.mxu1 }
0x1021   :  { %v2025_v47 = vadd.f32 %v2024_v45, %v1961_v43 }
0x1022   :  { %v4504_v48 = vpop.f32.mrf.mxu1 }
0x1023   :  { %v2031_v49 = vadd.f32 %v2025_v47, %v1872_v19 }
0x1024   :  { %v2027_v52 = vpop.f32.mrf.mxu1 }
0x1025   :  { %v2028_v53 = vadd.f32 %v2027_v52, %v1961_v43  ;;  %v2033_v54 = vsel %vm146_vm2, %v2031_v49, 0.0 }
0x1026   :  { %2034 = vadd.xlane.f32.xlu0 %v2033_v54  ;;  %v4505_v55 = vpop.f32.mrf.mxu1 }
0x1027   :  { %v2032_v57 = vadd.f32 %v2028_v53, %v1873_v20  ;;  %v2061_v20 = vsub.s32 6, %v4994_v50  ;;  %v4702_v50 = vld [vmem:[%s5617_s8] sm:$0xff]  }
0x1029   :  { %v2036_v62 = vsel %vm146_vm2, %v2032_v57, 0.0  ;;  %v2062_v23 = vrot.slane %v5019_v1, %v2061_v20  ;;  %v2082_v1 = vrot.slane %v5315_v34, %v4997_v51 }
0x102a   :  { %2037 = vadd.xlane.f32.xlu1 %v2036_v62 }
0x10af   :  { %v2035_v58 = vpop.xlane.xlu0 %2034 }
0x10b0   :  { %v2039_v63 = vmul.f32 0.03125, %v2035_v58 }
0x10b2   :  { %v2041_v59 = vsub.f32 %v2031_v49, %v2039_v63 }
0x10b3   :  { %v2038_v60 = vpop.xlane.xlu1 %2037 }
0x10b4   :  { %v2040_v61 = vmul.f32 0.03125, %v2038_v60  ;;  %v2043_v0 = vmul.f32 %v2041_v59, %v2041_v59 }
0x10b6   :  { %v2042_v2 = vsub.f32 %v2032_v57, %v2040_v61  ;;  %v2045_v3 = vsel %vm146_vm2, %v2043_v0, 0.0 }
0x10b7   :  { %2046 = vadd.xlane.f32.xlu0 %v2045_v3 }
0x10b8   :  { %v2044_v5 = vmul.f32 %v2042_v2, %v2042_v2 }
0x10ba   :  { %v2048_v10 = vsel %vm146_vm2, %v2044_v5, 0.0 }
0x10bb   :  { %2049 = vadd.xlane.f32.xlu1 %v2048_v10 }
0x1140   :  { %v2047_v14 = vpop.xlane.xlu0 %2046 }
0x1141   :  { %v2051_v15 = vmul.f32 0.03125, %v2047_v14 }
0x1143   :  { %v2053_v4 = vadd.f32 1e-12, %v2051_v15 }
0x1144   :  { %v2050_v16 = vpop.xlane.xlu1 %2049 }
0x1145   :  { %4747 = vrsqrt.f32 %v2053_v4  ;;  %v2052_v17 = vmul.f32 0.03125, %v2050_v16 }
0x1147   :  { %v2054_v19 = vadd.f32 1e-12, %v2052_v17 }
0x1149   :  { %4749 = vrsqrt.f32 %v2054_v19 }
0x1152   :  { %v4748_v21 = vpop.eup %4747 }
0x1153   :  { %v2057_v22 = vmul.f32 %v4748_v21, %v2041_v59 }
0x1155   :  { %v2063_v28 = vmul.f32 %v2062_v23, %v2057_v22 }
0x1156   :  { %v4750_v25 = vpop.eup %4749 }
0x1157   :  { %v2058_v27 = vmul.f32 %v4750_v25, %v2042_v2  ;;  %v5303_v31 = vadd.f32 %v2068_v29, %v2063_v28 }
0x1159   :  { %v2064_v30 = vmul.f32 %v2062_v23, %v2058_v27 }
0x115b   :  { %v5305_v32 = vadd.f32 %v2068_v29, %v2064_v30 }
0x115d   :  { %v2078_v33 = vpack.c.bf16 %v5305_v32, %v5303_v31 }
0x115f   :  { %4511 = vmatmul.mubr.msk.bf16.vlgmr.msra.gmra.mxu0 %vm146_vm2, %v2078_v33 }
0x1160   :  { %4516 = vmatprep.mubr.msk.f32.mxu0 %vm4847_vm3, %v4846_v42 }
0x121f   :  { %v2132_v44 = vpop.f32.mrf.mxu0 }
0x1220   :  { %v5319_v6 = vadd.f32 %v2132_v44, %v2082_v1 }
0x1221   :  { %v4512_v35 = vpop.f32.mrf.mxu0 }
0x1222   :  { %2140 = vrot.lane.b32.xlu0 %v5319_v6, %s4848_s15 }
0x1223   :  { %v2135_v36 = vpop.f32.mrf.mxu0 }
0x1224   :  { %v5323_v46 = vadd.f32 %v2135_v36, %v2082_v1 }
0x1225   :  { %v4513_v9 = vpop.f32.mrf.mxu0 }
0x1226   :  { %2217 = vrot.lane.b32.xlu1 %v5323_v46, %s4848_s15  ;;  %s4860_s15 = smov [#allocation2]  }
0x1294   :  { %v2141_v37 = vpop.permute.xlu0 %2140 }
0x1295   :  { %4515 = vmatpush3.xpose.msk.msra.mxu0 %vm263_vm4, %v2141_v37 }
0x1296   :  { %4524 = vmatprep.subr.mxu0 %v4846_v42 }
0x1298   :  { %4517 = vmatmul.mubr.msk.f32.vlgmr.msra.gmra.mxu0 %vm263_vm4, %v5319_v6  ;;  %v2218_v51 = vpop.permute.xlu1 %2217 }
0x1299   :  { %4520 = vmatpush3.xpose.msk.msra.mxu1 %vm263_vm4, %v2218_v51  ;;  %4526 = vmatprep.mubr.msk.f32.mxu0 %vm4847_vm3, %v4846_v42 }
0x129a   :  { %4529 = vmatprep.subr.mxu1 %v4846_v42 }
0x129c   :  { %4522 = vmatmul.mubr.msk.f32.vlgmr.msra.gmra.mxu1 %vm263_vm4, %v5323_v46 }
0x129d   :  { %4531 = vmatprep.mubr.msk.f32.mxu1 %vm4847_vm3, %v4846_v42 }
0x1358   :  { %v2212_v38 = vpop.f32.mrf.mxu0 }
0x1359   :  { %v2293_v39 = vmul.f32 0.35355338, %v2212_v38 }
0x135a   :  { %v4518_v40 = vpop.f32.mrf.mxu0 }
0x135b   :  { %v2295_v43 = vadd.f32 %v2293_v39, %v5050_v18 }
0x135c   :  { %v2289_v45 = vpop.f32.mrf.mxu1 }
0x135d   :  { %v2294_v47 = vmul.f32 0.35355338, %v2289_v45  ;;  %v2297_v48 = vsel %vm263_vm4, %v2295_v43, -inf }
0x135e   :  { %2298 = vmax.xlane.f32.xlu1 %v2297_v48  ;;  %v4523_v49 = vpop.f32.mrf.mxu1 }
0x135f   :  { %v2296_v52 = vadd.f32 %v2294_v47, %v5054_v24 }
0x1361   :  { %v2300_v53 = vsel %vm263_vm4, %v2296_v52, -inf }
0x1362   :  { %2301 = vmax.xlane.f32.xlu0 %v2300_v53  ;;  %v4689_v53 = vld [vmem:[%s5615_s6 + $0x20] ss:$0 sps:$4 sm:$0xff]  }
0x136f   :  { %2395 = vrot.lane.b32.xlu1 %v5323_v46, %s4849_s1 }
0x1373   :  { %2475 = vrot.lane.b32.xlu1 %v5319_v6, %s4850_s20 }
0x1378   :  { %2319 = vrot.lane.b32.xlu0 %v5319_v6, %s4849_s1  ;;  %s4071_s1 = sshll.u32 %s4860_s15, 4  ;;  %s4072_s1 = int_to_ptr.vmem [resolvable:$true] %s4071_s1 }
0x1379   :  { %p4805_p1 = scmp.lt.s32.totalorder %s4072_s1, %s4072_s1 }
0x13e7   :  { %v2299_v54 = vpop.xlane.xlu1 %2298 }
0x13e8   :  { %v2303_v55 = vsub.f32 %v2295_v43, %v2299_v54  ;;  %v4690_v54 = vld [vmem:[%s5615_s6 + $0x28] ss:$0 sps:$4 sm:$0xff]  }
0x13ea   :  { %v2305_v57 = vmul.f32 1.442695, %v2303_v55 }
0x13eb   :  { %v2396_v62 = vpop.permute.xlu1 %2395  ;;  %v2302_v58 = vpop.xlane.xlu0 %2301 }
0x13ec   :  { %4751 = vpow2.f32 %v2305_v57  ;;  %v2304_v63 = vsub.f32 %v2296_v52, %v2302_v58  ;;  %4530 = vmatpush3.msra.mxu1 %v2396_v62 }
0x13ed   :  { %4539 = vmatprep.subr.mxu1 %v4846_v42 }
0x13ee   :  { %v2307_v59 = vmul.f32 1.442695, %v2304_v63 }
0x13ef   :  { %v2320_v60 = vpop.permute.xlu0 %2319  ;;  %v2476_v5 = vpop.permute.xlu1 %2475 }
0x13f0   :  { %4753 = vpow2.f32 %v2307_v59  ;;  %4525 = vmatpush3.msra.mxu0 %v2320_v60 }
0x13f1   :  { %4534 = vmatprep.subr.mxu0 %v4846_v42 }
0x13f9   :  { %v4752_v61 = vpop.eup %4751 }
0x13fa   :  { %v2309_v0 = vsel %vm263_vm4, %v4752_v61, 0.0 }
0x13fb   :  { %2310 = vadd.xlane.f32.xlu0 %v2309_v0 }
0x13fd   :  { %v4754_v2 = vpop.eup %4753 }
0x13fe   :  { %v2312_v3 = vsel %vm263_vm4, %v4754_v2, 0.0 }
0x13ff   :  { %2313 = vadd.xlane.f32.xlu1 %v2312_v3 }
0x1410   :  { %2473 = vrot.lane.b32.xlu1 %v5319_v6, %s4851_s21 }
0x1411   :  { %2553 = vrot.lane.b32.xlu0 %v5323_v46, %s4850_s20  ;;  %s4800_s20 = scalar_lea.vmem %s4072_s1, 256 }
0x1412   :  { %p4801_p0 = scmp.ne.s32.totalorder %s4072_s1, %s4800_s20  ;;  %p4806_p2 = scmp.lt.s32.totalorder %s4800_s20, %s4800_s20 }
0x1414   :  { %p4807_p3 = por %p4806_p2, %p4805_p1 }
0x1415   :  { %2551 = vrot.lane.b32.xlu0 %v5323_v46, %s4851_s21 }
0x1416   :  { %p4808_p4 = pnand %p4807_p3, %p4801_p0 }
0x1484   :  { %v2311_v10 = vpop.xlane.xlu0 %2310 }
0x1485   :  { %4755 = vrcp.f32 %v2311_v10 }
0x1488   :  { %v2314_v11 = vpop.xlane.xlu1 %2313  ;;  %v2554_v4 = vpop.permute.xlu0 %2553 }
0x1489   :  { %4757 = vrcp.f32 %v2314_v11 }
0x148c   :  { %v2474_v17 = vpop.permute.xlu1 %2473  ;;  %v2552_v19 = vpop.permute.xlu0 %2551 }
0x1492   :  { %v4756_v12 = vpop.eup %4755 }
0x1493   :  { %v2317_v14 = vmul.f32 %v4756_v12, %v4752_v61 }
0x1495   :  { %4527 = vmatmul.mubr.msk.f32.vlgmr.msra.gmra.mxu0 %vm263_vm4, %v2317_v14 }
0x1496   :  { %v4758_v15 = vpop.eup %4757  ;;  %4535 = vmatpush3.xpose.msk.msra.mxu0 %vm263_vm4, %v2476_v5  ;;  %4536 = vmatprep.mubr.msk.f32.mxu0 %vm4847_vm3, %v4846_v42 }
0x1497   :  { %v2318_v16 = vmul.f32 %v4758_v15, %v4754_v2  ;;  %4544 = vmatprep.subr.mxu0 %v4846_v42 }
0x1499   :  { %4532 = vmatmul.mubr.msk.f32.vlgmr.msra.gmra.mxu1 %vm263_vm4, %v2318_v16  ;;  %4537 = vmatmul.mubr.msk.f32.vlgmr.msra.gmra.mxu0 %vm263_vm4, %v2474_v17 }
0x149a   :  { %4540 = vmatpush3.xpose.msk.msra.mxu1 %vm263_vm4, %v2554_v4  ;;  %4541 = vmatprep.mubr.msk.f32.mxu1 %vm4847_vm3, %v4846_v42 }
0x149b   :  { %4549 = vmatprep.subr.mxu1 %v4846_v42  ;;  %4546 = vmatprep.mubr.msk.f32.mxu0 %vm4847_vm3, %v4846_v42 }
0x149d   :  { %4542 = vmatmul.mubr.msk.f32.vlgmr.msra.gmra.mxu1 %vm263_vm4, %v2552_v19 }
0x149e   :  { %4551 = vmatprep.mubr.msk.f32.mxu1 %vm4847_vm3, %v4846_v42 }
0x1555   :  { %v5375_v21 = vpop.f32.mrf.mxu0 }
0x1557   :  { %v4528_v22 = vpop.f32.mrf.mxu0 }
0x1559   :  { %v5377_v23 = vpop.f32.mrf.mxu1  ;;  %v2547_v25 = vpop.f32.mrf.mxu0 }
0x155a   :  { %v2472_v27 = vpack.c.bf16 %v5377_v23, %v5375_v21  ;;  %v2629_v28 = vmul.f32 0.35355338, %v2547_v25 }
0x155b   :  { %v4533_v29 = vpop.f32.mrf.mxu1  ;;  %v4538_v30 = vpop.f32.mrf.mxu0 }
0x155c   :  { %v2631_v33 = vadd.f32 %v2629_v28, %v5050_v18 }
0x155d   :  { %v2625_v1 = vpop.f32.mrf.mxu1 }
0x155e   :  { %v2630_v44 = vmul.f32 0.35355338, %v2625_v1  ;;  %v2633_v35 = vsel %vm263_vm4, %v2631_v33, -inf }
0x155f   :  { %2634 = vmax.xlane.f32.xlu1 %v2633_v35  ;;  %v4543_v36 = vpop.f32.mrf.mxu1 }
0x1560   :  { %v2632_v9 = vadd.f32 %v2630_v44, %v5054_v24 }
0x1562   :  { %v2636_v37 = vsel %vm263_vm4, %v2632_v9, -inf }
0x1563   :  { %2637 = vmax.xlane.f32.xlu0 %v2636_v37 }
0x15e8   :  { %v2635_v51 = vpop.xlane.xlu1 %2634 }
0x15e9   :  { %v2639_v38 = vsub.f32 %v2631_v33, %v2635_v51 }
0x15eb   :  { %v2641_v39 = vmul.f32 1.442695, %v2639_v38 }
0x15ec   :  { %v2638_v40 = vpop.xlane.xlu0 %2637 }
0x15ed   :  { %4759 = vpow2.f32 %v2641_v39  ;;  %v2640_v43 = vsub.f32 %v2632_v9, %v2638_v40 }
0x15ef   :  { %v2643_v45 = vmul.f32 1.442695, %v2640_v43 }
0x15f1   :  { %4761 = vpow2.f32 %v2643_v45 }
0x15fa   :  { %v4760_v47 = vpop.eup %4759 }
0x15fb   :  { %v2645_v48 = vsel %vm263_vm4, %v4760_v47, 0.0 }
0x15fc   :  { %2646 = vadd.xlane.f32.xlu0 %v2645_v48 }
0x15fe   :  { %v4762_v49 = vpop.eup %4761 }
0x15ff   :  { %v2648_v52 = vsel %vm263_vm4, %v4762_v49, 0.0 }
0x1600   :  { %2649 = vadd.xlane.f32.xlu1 %v2648_v52 }
0x1611   :  { %2731 = vrot.lane.b32.xlu1 %v5323_v46, %s4852_s22 }
0x1612   :  { %2655 = vrot.lane.b32.xlu0 %v5319_v6, %s4852_s22 }
0x1615   :  { %2864 = vrot.lane.b32.xlu1 %v4689_v53, %s4853_s25 }
0x1616   :  { %2993 = vrot.lane.b32.xlu0 %v5323_v46, %s4855_s27 }
0x1619   :  { %2991 = vrot.lane.b32.xlu1 %v5323_v46, %s4854_s26 }
0x161a   :  { %2812 = vrot.lane.b32.xlu0 %v4690_v54, %s4853_s25 }
0x161d   :  { %2915 = vrot.lane.b32.xlu1 %v5319_v6, %s4855_s27 }
0x161e   :  { %2913 = vrot.lane.b32.xlu0 %v5319_v6, %s4854_s26 }
0x1685   :  { %v2647_v55 = vpop.xlane.xlu0 %2646 }
0x1686   :  { %4763 = vrcp.f32 %v2647_v55 }
0x1689   :  { %v2650_v57 = vpop.xlane.xlu1 %2649  ;;  %v2656_v62 = vpop.permute.xlu0 %2655 }
0x168a   :  { %4765 = vrcp.f32 %v2650_v57  ;;  %4545 = vmatpush3.msra.mxu0 %v2656_v62 }
0x168b   :  { %4554 = vmatprep.subr.bf16.mxu0 %v4846_v42 }
0x168d   :  { %v2732_v58 = vpop.permute.xlu1 %2731  ;;  %v2994_v63 = vpop.permute.xlu0 %2993 }
0x168e   :  { %4550 = vmatpush3.msra.mxu1 %v2732_v58 }
0x168f   :  { %4560 = vmatprep.subr.bf16.mxu1 %v4846_v42 }
0x1691   :  { %v2813_v60 = vpop.permute.xlu0 %2812  ;;  %v2865_v3 = vpop.permute.xlu1 %2864 }
0x1692   :  { %v2818_v61 = vsel %vm951_vm5, %v2813_v60, 0  ;;  %v2870_v5 = vsel %vm951_vm5, %v2865_v3, 0 }
0x1693   :  { %v4764_v59 = vpop.eup %4763 }
0x1694   :  { %v2653_v0 = vmul.f32 %v4764_v59, %v4760_v47 }
0x1695   :  { %v2992_v11 = vpop.permute.xlu1 %2991  ;;  %v2914_v23 = vpop.permute.xlu0 %2913 }
0x1696   :  { %4547 = vmatmul.mubr.msk.f32.vlgmr.msra.gmra.mxu0 %vm263_vm4, %v2653_v0 }
0x1697   :  { %v4766_v2 = vpop.eup %4765  ;;  %4555 = vmatpush3.bf16.msra.mxu0 %v2818_v61  ;;  %4556 = vmatprep.mubr.msk.bf16.mxu0 %vm4847_vm3, %v4846_v42 }
0x1698   :  { %v2654_v10 = vmul.f32 %v4766_v2, %v4762_v49  ;;  %4566 = vmatprep.subr.mxu0 %v4846_v42  ;;  %v4691_v49 = vld [vmem:[%s5615_s6 + $0x30] ss:$0 sps:$4 sm:$0xff]  }
0x1699   :  { %v2916_v17 = vpop.permute.xlu1 %2915 }
0x169a   :  { %4552 = vmatmul.mubr.msk.f32.vlgmr.msra.gmra.mxu1 %vm263_vm4, %v2654_v10 }
0x169b   :  { %4561 = vmatpush3.bf16.msra.mxu1 %v2870_v5  ;;  %4562 = vmatprep.mubr.msk.bf16.mxu1 %vm4847_vm3, %v4846_v42 }
0x169c   :  { %4571 = vmatprep.subr.mxu1 %v4846_v42 }
0x169e   :  { %4563 = vmatmul.mubr.msk.bf16.vlgmr.msra.gmra.mxu1 %vm263_vm4, %v2472_v27 }
0x169f   :  { %4572 = vmatpush3.xpose.msk.msra.mxu1 %vm263_vm4, %v2994_v63  ;;  %4573 = vmatprep.mubr.msk.f32.mxu1 %vm4847_vm3, %v4846_v42 }
0x16a0   :  { %4581 = vmatprep.subr.mxu1 %v4846_v42 }
0x16a6   :  { %4574 = vmatmul.mubr.msk.f32.vlgmr.msra.gmra.mxu1 %vm263_vm4, %v2992_v11 }
0x16a7   :  { %4583 = vmatprep.mubr.msk.f32.mxu1 %vm4847_vm3, %v4846_v42 }
0x1756   :  { %v2727_v12 = vpop.f32.mrf.mxu0 }
0x1758   :  { %v4548_v14 = vpop.f32.mrf.mxu0 }
0x175a   :  { %v2803_v15 = vpop.f32.mrf.mxu1 }
0x175b   :  { %v2808_v4 = vpack.c.bf16 %v2803_v15, %v2727_v12 }
0x175c   :  { %v4553_v16 = vpop.f32.mrf.mxu1 }
0x175d   :  { %4557 = vmatmul.mubr.msk.bf16.vlgmr.msra.gmra.mxu0 %vm263_vm4, %v2808_v4 }
0x175e   :  { %4567 = vmatpush3.xpose.msk.msra.mxu0 %vm263_vm4, %v2916_v17  ;;  %v5432_v19 = vpop.f32.mrf.mxu1  ;;  %4568 = vmatprep.mubr.msk.f32.mxu0 %vm4847_vm3, %v4846_v42 }
0x175f   :  { %4576 = vmatprep.subr.mxu0 %v4846_v42 }
0x1760   :  { %v4564_v21 = vpop.f32.mrf.mxu1 }
0x1762   :  { %v5437_v22 = vpop.f32.mrf.mxu1 }
0x1764   :  { %v4565_v25 = vpop.f32.mrf.mxu1 }
0x1765   :  { %4569 = vmatmul.mubr.msk.f32.vlgmr.msra.gmra.mxu0 %vm263_vm4, %v2914_v23 }
0x1766   :  { %v3065_v27 = vpop.f32.mrf.mxu1  ;;  %4578 = vmatprep.mubr.msk.f32.mxu0 %vm4847_vm3, %v4846_v42 }
0x1767   :  { %v3070_v28 = vmul.f32 0.35355338, %v3065_v27 }
0x1768   :  { %v4575_v29 = vpop.f32.mrf.mxu1 }
0x1769   :  { %v3072_v30 = vadd.f32 %v3070_v28, %v5054_v24 }
0x176b   :  { %v3076_v33 = vsel %vm263_vm4, %v3072_v30, -inf }
0x176c   :  { %3077 = vmax.xlane.f32.xlu1 %v3076_v33 }
0x177d   :  { %3305 = vrot.lane.b32.xlu1 %v5319_v6, %s4856_s2 }
0x1781   :  { %3303 = vrot.lane.b32.xlu1 %v5319_v6, %s4857_s3 }
0x1785   :  { %3381 = vrot.lane.b32.xlu1 %v5323_v46, %s4857_s3 }
0x17f5   :  { %v3078_v1 = vpop.xlane.xlu1 %3077 }
0x17f6   :  { %v3080_v44 = vsub.f32 %v3072_v30, %v3078_v1 }
0x17f8   :  { %v3083_v35 = vmul.f32 1.442695, %v3080_v44 }
0x17f9   :  { %v3306_v54 = vpop.permute.xlu1 %3305 }
0x17fa   :  { %4767 = vpow2.f32 %v3083_v35 }
0x17fd   :  { %v3304_v62 = vpop.permute.xlu1 %3303 }
0x1801   :  { %v3382_v58 = vpop.permute.xlu1 %3381 }
0x1807   :  { %v4768_v36 = vpop.eup %4767 }
0x1808   :  { %v3088_v9 = vsel %vm263_vm4, %v4768_v36, 0.0 }
0x1809   :  { %3089 = vadd.xlane.f32.xlu0 %v3088_v9 }
0x181d   :  { %v5451_v37 = vpop.f32.mrf.mxu0 }
0x181f   :  { %v4558_v51 = vpop.f32.mrf.mxu0  ;;  %3171 = vrot.lane.b32.xlu0 %v5323_v46, %s4858_s29 }
0x1821   :  { %v5455_v38 = vpop.f32.mrf.mxu0 }
0x1823   :  { %v4559_v39 = vpop.f32.mrf.mxu0  ;;  %3383 = vrot.lane.b32.xlu0 %v5323_v46, %s4856_s2 }
0x1825   :  { %v2987_v40 = vpop.f32.mrf.mxu0 }
0x1826   :  { %v3069_v45 = vmul.f32 0.35355338, %v2987_v40 }
0x1827   :  { %v4570_v43 = vpop.f32.mrf.mxu0 }
0x1828   :  { %v3071_v47 = vadd.f32 %v3069_v45, %v5050_v18  ;;  %v4692_v43 = vld [vmem:[%s5615_s6 + $0x38] ss:$0 sps:$4 sm:$0xff]  }
0x182a   :  { %v3073_v48 = vsel %vm263_vm4, %v3071_v47, -inf }
0x1842   :  { %3074 = vmax.xlane.f32.xlu0 %v3073_v48 }
0x1858   :  { %3095 = vrot.lane.b32.xlu0 %v5319_v6, %s4858_s29 }
0x185c   :  { %3252 = vrot.lane.b32.xlu0 %v4691_v49, %s4853_s25 }
0x1860   :  { %3561 = vrot.lane.b32.xlu0 %v5323_v46, %s4859_s12 }
0x1864   :  { %3642 = vrot.lane.b32.xlu0 %v4692_v43, %s4853_s25 }
0x1892   :  { %v3090_v52 = vpop.xlane.xlu0 %3089 }
0x1893   :  { %4769 = vrcp.f32 %v3090_v52 }
0x1896   :  { %v3172_v53 = vpop.permute.xlu0 %3171 }
0x1897   :  { %4582 = vmatpush3.msra.mxu1 %v3172_v53 }
0x1898   :  { %4592 = vmatprep.subr.mxu1 %v4846_v42 }
0x189a   :  { %v3384_v46 = vpop.permute.xlu0 %3383 }
0x18a0   :  { %v4770_v55 = vpop.eup %4769 }
0x18a1   :  { %v3094_v57 = vmul.f32 %v4770_v55, %v4768_v36 }
0x18a3   :  { %4584 = vmatmul.mubr.msk.f32.vlgmr.msra.gmra.mxu1 %vm263_vm4, %v3094_v57 }
0x18a4   :  { %4593 = vmatpush3.xpose.msk.msra.mxu1 %vm263_vm4, %v3306_v54  ;;  %4594 = vmatprep.mubr.msk.f32.mxu1 %vm4847_vm3, %v4846_v42 }
0x18a5   :  { %4597 = vmatprep.subr.mxu1 %v4846_v42 }
0x18a7   :  { %4595 = vmatmul.mubr.msk.f32.vlgmr.msra.gmra.mxu1 %vm263_vm4, %v3304_v62 }
0x18a8   :  { %4598 = vmatpush3.xpose.msk.msra.mxu1 %vm263_vm4, %v3384_v46  ;;  %4599 = vmatprep.mubr.msk.f32.mxu1 %vm4847_vm3, %v4846_v42 }
0x18a9   :  { %4607 = vmatprep.subr.mxu1 %v4846_v42 }
0x18ab   :  { %4600 = vmatmul.mubr.msk.f32.vlgmr.msra.gmra.mxu1 %vm263_vm4, %v3382_v58  ;;  %v2907_v58 = vadd.f32 %v5432_v19, %v5451_v37  ;;  %v3696_v19 = vrot.slane %v5315_v34, %v5004_v56 }
0x18ac   :  { %4609 = vmatprep.mubr.msk.f32.mxu1 %vm4847_vm3, %v4846_v42 }
0x18cb   :  { %v3075_v63 = vpop.xlane.xlu0 %3074 }
0x18cc   :  { %v3079_v59 = vsub.f32 %v3071_v47, %v3075_v63 }
0x18ce   :  { %v3081_v60 = vmul.f32 1.442695, %v3079_v59 }
0x18cf   :  { %v3096_v61 = vpop.permute.xlu0 %3095 }
0x18d0   :  { %4771 = vpow2.f32 %v3081_v60  ;;  %4577 = vmatpush3.msra.mxu0 %v3096_v61  ;;  %v2910_v61 = vadd.f32 %v5437_v22, %v5455_v38 }
0x18d1   :  { %4586 = vmatprep.subr.bf16.mxu0 %v4846_v42 }
0x18d3   :  { %v3253_v0 = vpop.permute.xlu0 %3252 }
0x18d4   :  { %v3258_v30 = vsel %vm951_vm5, %v3253_v0, 0 }
0x18d7   :  { %v3562_v2 = vpop.permute.xlu0 %3561 }
0x18d8   :  { %4608 = vmatpush3.msra.mxu1 %v3562_v2 }
0x18d9   :  { %4618 = vmatprep.subr.bf16.mxu1 %v4846_v42 }
0x18db   :  { %v3643_v62 = vpop.permute.xlu0 %3642 }
0x18dc   :  { %v3648_v46 = vsel %vm951_vm5, %v3643_v62, 0 }
0x18dd   :  { %v4772_v3 = vpop.eup %4771 }
0x18de   :  { %v3085_v5 = vsel %vm263_vm4, %v4772_v3, 0.0 }
0x18df   :  { %3086 = vadd.xlane.f32.xlu1 %v3085_v5 }
0x1963   :  { %v3243_v10 = vpop.f32.mrf.mxu1 }
0x1965   :  { %v4585_v11 = vpop.f32.mrf.mxu1 }
0x1967   :  { %v3377_v12 = vpop.f32.mrf.mxu1 }
0x1968   :  { %v3459_v14 = vmul.f32 0.35355338, %v3377_v12  ;;  %v3087_v15 = vpop.xlane.xlu1 %3086 }
0x1969   :  { %4773 = vrcp.f32 %v3087_v15  ;;  %v4596_v4 = vpop.f32.mrf.mxu1 }
0x196a   :  { %v3461_v16 = vadd.f32 %v3459_v14, %v5050_v18 }
0x196b   :  { %v3455_v17 = vpop.f32.mrf.mxu1 }
0x196c   :  { %v3460_v21 = vmul.f32 0.35355338, %v3455_v17  ;;  %v3463_v23 = vsel %vm263_vm4, %v3461_v16, -inf }
0x196d   :  { %3464 = vmax.xlane.f32.xlu1 %v3463_v23  ;;  %v4601_v25 = vpop.f32.mrf.mxu1 }
0x196e   :  { %v3462_v27 = vadd.f32 %v3460_v21, %v5054_v24 }
0x1970   :  { %v3466_v28 = vsel %vm263_vm4, %v3462_v27, -inf }
0x1971   :  { %3467 = vmax.xlane.f32.xlu1 %v3466_v28 }
0x1976   :  { %v4774_v29 = vpop.eup %4773 }
0x1977   :  { %v3093_v33 = vmul.f32 %v4774_v29, %v4772_v3 }
0x1979   :  { %4579 = vmatmul.mubr.msk.f32.vlgmr.msra.gmra.mxu0 %vm263_vm4, %v3093_v33 }
0x197a   :  { %4587 = vmatpush3.bf16.msra.mxu0 %v3258_v30  ;;  %4588 = vmatprep.mubr.msk.bf16.mxu0 %vm4847_vm3, %v4846_v42 }
0x197b   :  { %4602 = vmatprep.subr.mxu0 %v4846_v42 }
0x19f6   :  { %v3465_v18 = vpop.xlane.xlu1 %3464 }
0x19f7   :  { %v3469_v1 = vsub.f32 %v3461_v16, %v3465_v18 }
0x19f9   :  { %v3471_v44 = vmul.f32 1.442695, %v3469_v1 }
0x19fa   :  { %v3468_v35 = vpop.xlane.xlu1 %3467 }
0x19fb   :  { %4775 = vpow2.f32 %v3471_v44  ;;  %v3470_v24 = vsub.f32 %v3462_v27, %v3468_v35 }
0x19fd   :  { %v3473_v36 = vmul.f32 1.442695, %v3470_v24 }
0x19ff   :  { %4777 = vpow2.f32 %v3473_v36  ;;  %v4694_v36 = vld [vmem:[%s5615_s6 + $0x24] ss:$8 sps:$4 sm:$0xff]  }
0x1a08   :  { %v4776_v9 = vpop.eup %4775 }
0x1a09   :  { %v3475_v51 = vsel %vm263_vm4, %v4776_v9, 0.0 }
0x1a0a   :  { %3476 = vadd.xlane.f32.xlu1 %v3475_v51 }
0x1a0c   :  { %v4778_v39 = vpop.eup %4777 }
0x1a0d   :  { %v3478_v40 = vsel %vm263_vm4, %v4778_v39, 0.0 }
0x1a0e   :  { %3479 = vadd.xlane.f32.xlu1 %v3478_v40 }
0x1a1f   :  { %3485 = vrot.lane.b32.xlu1 %v5319_v6, %s4859_s12 }
0x1a39   :  { %v3167_v45 = vpop.f32.mrf.mxu0 }
0x1a3a   :  { %v3248_v47 = vpack.c.bf16 %v3243_v10, %v3167_v45 }
0x1a3b   :  { %v4580_v48 = vpop.f32.mrf.mxu0 }
0x1a3c   :  { %4589 = vmatmul.mubr.msk.bf16.vlgmr.msra.gmra.mxu0 %vm263_vm4, %v3248_v47 }
0x1a3d   :  { %4604 = vmatprep.mubr.msk.f32.mxu0 %vm4847_vm3, %v4846_v42 }
0x1a93   :  { %v3477_v49 = vpop.xlane.xlu1 %3476 }
0x1a94   :  { %4779 = vrcp.f32 %v3477_v49  ;;  %v3730_v49 = vrot.slane %v5315_v34, %v1864_v8  ;;  %v4695_v8 = vld [vmem:[%s5616_s7 + $0x38] sm:$0xff]  }
0x1a97   :  { %v3480_v52 = vpop.xlane.xlu1 %3479 }
0x1a98   :  { %4781 = vrcp.f32 %v3480_v52 }
0x1a9b   :  { %v3486_v53 = vpop.permute.xlu1 %3485 }
0x1a9c   :  { %4603 = vmatpush3.msra.mxu0 %v3486_v53 }
0x1a9d   :  { %4612 = vmatprep.subr.bf16.mxu0 %v4846_v42 }
0x1aa1   :  { %v4780_v6 = vpop.eup %4779 }
0x1aa2   :  { %v3483_v54 = vmul.f32 %v4780_v6, %v4776_v9 }
0x1aa4   :  { %4605 = vmatmul.mubr.msk.f32.vlgmr.msra.gmra.mxu0 %vm263_vm4, %v3483_v54  ;;  %v3736_v54 = vrot.slane %v5315_v34, %v1870_v13  ;;  %v4696_v13 = vld [vmem:[%s5616_s7 + $0x30] sm:$0xff]  }
0x1aa5   :  { %v4782_v55 = vpop.eup %4781  ;;  %4614 = vmatprep.mubr.msk.bf16.mxu0 %vm4847_vm3, %v4846_v42  ;;  %4613 = vmatpush3.bf16.msra.mxu0 %v3648_v46 }
0x1aa6   :  { %v3484_v57 = vmul.f32 %v4782_v55, %v4778_v39  ;;  %4626 = vmatprep.subr.bf16.mxu0 %v4846_v42 }
0x1aa8   :  { %4610 = vmatmul.mubr.msk.f32.vlgmr.msra.gmra.mxu1 %vm263_vm4, %v3484_v57 }
0x1aa9   :  { %4622 = vmatprep.mubr.msk.bf16.mxu1 %vm4847_vm3, %v4846_v42 }
0x1afc   :  { %v3294_v63 = vpop.f32.mrf.mxu0 }
0x1afd   :  { %v3301_v59 = vadd.f32 %v3294_v63, %v2907_v58  ;;  %v4697_v58 = vld [vmem:[%s5616_s7 + $0x28] sm:$0xff]   ;;  %v4698_v63 = vld [vmem:[%s5616_s7 + $0x20] sm:$0xff]  }
0x1afe   :  { %v4590_v60 = vpop.f32.mrf.mxu0 }
0x1b00   :  { %v3297_v0 = vpop.f32.mrf.mxu0 }
0x1b01   :  { %v3302_v2 = vadd.f32 %v3297_v0, %v2910_v61 }
0x1b02   :  { %v4591_v3 = vpop.f32.mrf.mxu0 }
0x1b64   :  { %v3557_v5 = vpop.f32.mrf.mxu0 }
0x1b66   :  { %v4606_v10 = vpop.f32.mrf.mxu0 }
0x1b68   :  { %v3633_v11 = vpop.f32.mrf.mxu1 }
0x1b69   :  { %v3638_v12 = vpack.c.bf16 %v3633_v11, %v3557_v5 }
0x1b6a   :  { %v4611_v14 = vpop.f32.mrf.mxu1 }
0x1b6b   :  { %4615 = vmatmul.mubr.msk.bf16.vlgmr.msra.gmra.mxu0 %vm263_vm4, %v3638_v12 }
0x1b6c   :  { %4634 = vmatprep.mubr.msk.bf16.mxu0 %vm4847_vm3, %v4846_v42  ;;  %4627 = vmatpush3.bf16.msra.mxu0 %v4695_v8  ;;  %v4701_v8 = vld [vmem:[%s5617_s8 + $0x8] sm:$0xff]  }
0x1b6d   :  { %4628 = vmatprep.subr.bf16.mxu0 %v4846_v42 }
0x1b70   :  { %4629 = vmatpush3.bf16.msra.mxu0 %v4696_v13 }
0x1b71   :  { %4630 = vmatprep.subr.bf16.mxu0 %v4846_v42 }
0x1b74   :  { %4631 = vmatpush3.bf16.msra.mxu0 %v4697_v58 }
0x1b75   :  { %4632 = vmatprep.subr.bf16.mxu0 %v4846_v42 }
0x1b78   :  { %4633 = vmatpush3.bf16.msra.mxu0 %v4698_v63 }
0x1c2b   :  { %v3684_v37 = vpop.f32.mrf.mxu0 }
0x1c2c   :  { %v3691_v15 = vadd.f32 %v3684_v37, %v3301_v59  ;;  %v3747_v59 = vrot.slane %v5315_v34, %v1881_v26  ;;  %v3827_v26 = vrot.slane %v5315_v34, %v1960_v41 }
0x1c2d   :  { %v4616_v4 = vpop.f32.mrf.mxu0 }
0x1c2e   :  { %v3697_v22 = vadd.f32 %v3696_v19, %v3691_v15 }
0x1c2f   :  { %v3687_v38 = vpop.f32.mrf.mxu0 }
0x1c30   :  { %v3692_v16 = vadd.f32 %v3687_v38, %v3302_v2  ;;  %v3699_v17 = vadd.f32 %v3697_v22, %v5303_v31 }
0x1c31   :  { %v4617_v21 = vpop.f32.mrf.mxu0 }
0x1c32   :  { %v3698_v23 = vadd.f32 %v3696_v19, %v3692_v16  ;;  %v3701_v25 = vsel %vm146_vm2, %v3699_v17, 0.0 }
0x1c33   :  { %3702 = vadd.xlane.f32.xlu0 %v3701_v25 }
0x1c34   :  { %v3700_v27 = vadd.f32 %v3698_v23, %v5305_v32  ;;  %v4693_v32 = vld [vmem:[%s5615_s6 + $0x34] ss:$8 sps:$4 sm:$0xff]  }
0x1c35   :  { %4619 = vmatpush3.bf16.msra.mxu1 %v4693_v32 }
0x1c36   :  { %v3704_v28 = vsel %vm146_vm2, %v3700_v27, 0.0  ;;  %4620 = vmatprep.subr.bf16.mxu1 %v4846_v42 }
0x1c37   :  { %3705 = vadd.xlane.f32.xlu1 %v3704_v28 }
0x1c39   :  { %4621 = vmatpush3.bf16.msra.mxu1 %v4694_v36 }
0x1c3a   :  { %4638 = vmatprep.subr.bf16.mxu1 %v4846_v42 }
0x1cbc   :  { %v3703_v29 = vpop.xlane.xlu0 %3702 }
0x1cbd   :  { %v3707_v56 = vmul.f32 0.03125, %v3703_v29 }
0x1cbf   :  { %v3709_v30 = vsub.f32 %v3699_v17, %v3707_v56 }
0x1cc0   :  { %v3706_v33 = vpop.xlane.xlu1 %3705 }
0x1cc1   :  { %v3708_v18 = vmul.f32 0.03125, %v3706_v33  ;;  %v3711_v1 = vmul.f32 %v3709_v30, %v3709_v30 }
0x1cc3   :  { %v3710_v44 = vsub.f32 %v3700_v27, %v3708_v18  ;;  %v3713_v35 = vsel %vm146_vm2, %v3711_v1, 0.0 }
0x1cc4   :  { %3714 = vadd.xlane.f32.xlu0 %v3713_v35 }
0x1cc5   :  { %v3712_v31 = vmul.f32 %v3710_v44, %v3710_v44 }
0x1cc7   :  { %v3716_v24 = vsel %vm146_vm2, %v3712_v31, 0.0 }
0x1cc8   :  { %3717 = vadd.xlane.f32.xlu0 %v3716_v24 }
0x1d4d   :  { %v3715_v9 = vpop.xlane.xlu0 %3714 }
0x1d4e   :  { %v3719_v51 = vmul.f32 0.03125, %v3715_v9 }
0x1d50   :  { %v3721_v39 = vadd.f32 1e-12, %v3719_v51  ;;  %v4699_v51 = vld [vmem:[%s5617_s8 + $0x8] sm:$0xff]  }
0x1d51   :  { %v3718_v40 = vpop.xlane.xlu0 %3717 }
0x1d52   :  { %4783 = vrsqrt.f32 %v3721_v39  ;;  %v3720_v43 = vmul.f32 0.03125, %v3718_v40  ;;  %v4700_v39 = vld [vmem:[%s5617_s8] sm:$0xff]  }
0x1d54   :  { %v3722_v45 = vadd.f32 1e-12, %v3720_v43 }
0x1d56   :  { %4785 = vrsqrt.f32 %v3722_v45 }
0x1d5f   :  { %v4784_v47 = vpop.eup %4783 }
0x1d60   :  { %v3725_v48 = vmul.f32 %v4784_v47, %v3709_v30 }
0x1d62   :  { %v3731_v6 = vmul.f32 %v3730_v49, %v3725_v48 }
0x1d63   :  { %v4786_v52 = vpop.eup %4785 }
0x1d64   :  { %v3726_v53 = vmul.f32 %v4786_v52, %v3710_v44  ;;  %v3737_v57 = vadd.f32 %v3736_v54, %v3731_v6  ;;  %v3927_v52 = vrot.slane %v5315_v34, %v2061_v20 }
0x1d66   :  { %v3732_v55 = vmul.f32 %v3730_v49, %v3726_v53 }
0x1d68   :  { %v3738_v62 = vadd.f32 %v3736_v54, %v3732_v55  ;;  %v3933_v54 = vrot.slane %v5315_v34, %v2067_v7 }
0x1d6a   :  { %v3743_v46 = vpack.c.bf16 %v3738_v62, %v3737_v57 }
0x1d6c   :  { %4623 = vmatmul.mubr.msk.bf16.vlgmr.msra.gmra.mxu1 %vm146_vm2, %v3743_v46 }
0x1d6d   :  { %4642 = vmatprep.mubr.msk.bf16.mxu1 %vm4847_vm3, %v4846_v42  ;;  %4639 = vmatpush3.bf16.msra.mxu1 %v4699_v51 }
0x1d6e   :  { %4640 = vmatprep.subr.bf16.mxu1 %v4846_v42 }
0x1d71   :  { %4641 = vmatpush3.bf16.msra.mxu1 %v4700_v39 }
0x1d72   :  { %4646 = vmatprep.subr.bf16.mxu1 %v4846_v42 }
0x1e2c   :  { %v3797_v60 = vpop.f32.mrf.mxu1 }
0x1e2d   :  { %v3798_v61 = vadd.f32 %v3797_v60, %v3747_v59 }
0x1e2e   :  { %v4624_v0 = vpop.f32.mrf.mxu1 }
0x1e2f   :  { %v3806_v2 = vmul.f32 0.70710677, %v3798_v61  ;;  %v3804_v37 = vmul.f32 0.5, %v3798_v61 }
0x1e30   :  { %v3800_v3 = vpop.f32.mrf.mxu1 }
0x1e31   :  { %4787 = verf.f32 %v3806_v2  ;;  %v3801_v5 = vadd.f32 %v3800_v3, %v3747_v59 }
0x1e32   :  { %v4625_v10 = vpop.f32.mrf.mxu1 }
0x1e33   :  { %v3807_v11 = vmul.f32 0.70710677, %v3801_v5  ;;  %v3805_v15 = vmul.f32 0.5, %v3801_v5 }
0x1e35   :  { %4789 = verf.f32 %v3807_v11 }
0x1e3e   :  { %v4788_v12 = vpop.eup %4787 }
0x1e3f   :  { %v3810_v14 = vadd.f32 1.0, %v4788_v12 }
0x1e41   :  { %v3812_v22 = vmul.f32 %v3810_v14, %v3804_v37 }
0x1e42   :  { %v4790_v19 = vpop.eup %4789 }
0x1e43   :  { %v3811_v4 = vadd.f32 1.0, %v4790_v19 }
0x1e45   :  { %v3813_v38 = vmul.f32 %v3811_v4, %v3805_v15 }
0x1e47   :  { %v3823_v16 = vpack.c.bf16 %v3813_v38, %v3812_v22 }
0x1e49   :  { %4635 = vmatmul.mubr.msk.bf16.vlgmr.msra.gmra.mxu0 %vm1986_vm6, %v3823_v16 }
0x1f09   :  { %v3889_v17 = vpop.f32.mrf.mxu0 }
0x1f0a   :  { %v3890_v21 = vadd.f32 %v3889_v17, %v3827_v26 }
0x1f0b   :  { %v4636_v23 = vpop.f32.mrf.mxu0 }
0x1f0c   :  { %v3896_v25 = vadd.f32 %v3890_v21, %v3737_v57 }
0x1f0d   :  { %v3892_v27 = vpop.f32.mrf.mxu0 }
0x1f0e   :  { %v3893_v28 = vadd.f32 %v3892_v27, %v3827_v26  ;;  %v3898_v29 = vsel %vm146_vm2, %v3896_v25, 0.0 }
0x1f0f   :  { %3899 = vadd.xlane.f32.xlu0 %v3898_v29  ;;  %v4637_v56 = vpop.f32.mrf.mxu0 }
0x1f10   :  { %v3897_v30 = vadd.f32 %v3893_v28, %v3738_v62 }
0x1f12   :  { %v3901_v33 = vsel %vm146_vm2, %v3897_v30, 0.0 }
0x1f13   :  { %3902 = vadd.xlane.f32.xlu1 %v3901_v33 }
0x1f98   :  { %v3900_v18 = vpop.xlane.xlu0 %3899 }
0x1f99   :  { %v3904_v1 = vmul.f32 0.03125, %v3900_v18 }
0x1f9b   :  { %v3906_v44 = vsub.f32 %v3896_v25, %v3904_v1 }
0x1f9c   :  { %v3903_v35 = vpop.xlane.xlu1 %3902 }
0x1f9d   :  { %v3905_v31 = vmul.f32 0.03125, %v3903_v35  ;;  %v3908_v41 = vmul.f32 %v3906_v44, %v3906_v44 }
0x1f9f   :  { %v3907_v24 = vsub.f32 %v3897_v30, %v3905_v31  ;;  %v3910_v32 = vsel %vm146_vm2, %v3908_v41, 0.0 }
0x1fa0   :  { %3911 = vadd.xlane.f32.xlu0 %v3910_v32 }
0x1fa1   :  { %v3909_v36 = vmul.f32 %v3907_v24, %v3907_v24 }
0x1fa3   :  { %v3913_v9 = vsel %vm146_vm2, %v3909_v36, 0.0 }
0x1fa4   :  { %3914 = vadd.xlane.f32.xlu1 %v3913_v9 }
0x2029   :  { %v3912_v40 = vpop.xlane.xlu0 %3911 }
0x202a   :  { %v3916_v43 = vmul.f32 0.03125, %v3912_v40 }
0x202c   :  { %v3918_v45 = vadd.f32 1e-12, %v3916_v43 }
0x202d   :  { %v3915_v47 = vpop.xlane.xlu1 %3914 }
0x202e   :  { %4791 = vrsqrt.f32 %v3918_v45  ;;  %v3917_v48 = vmul.f32 0.03125, %v3915_v47 }
0x2030   :  { %v3919_v49 = vadd.f32 1e-12, %v3917_v48 }
0x2032   :  { %4793 = vrsqrt.f32 %v3919_v49 }
0x203b   :  { %v4792_v53 = vpop.eup %4791 }
0x203c   :  { %v3922_v6 = vmul.f32 %v4792_v53, %v3906_v44 }
0x203e   :  { %v3928_v55 = vmul.f32 %v3927_v52, %v3922_v6 }
0x203f   :  { %v4794_v57 = vpop.eup %4793 }
0x2040   :  { %v3923_v62 = vmul.f32 %v4794_v57, %v3907_v24  ;;  %v3934_v46 = vadd.f32 %v3933_v54, %v3928_v55 }
0x2042   :  { %v3942_v13 = vpack.c.bf16 %v3934_v46, %v3934_v46  ;;  %3936 = vst.msk [vmem:[#allocation2] sm:$0xff] %vm146_vm2, %v3934_v46  ;;  %v3929_v58 = vmul.f32 %v3927_v52, %v3923_v62 }
0x2044   :  { %4643 = vmatmul.mubr.msk.bf16.vlgmr.msra.gmra.mxu1 %vm146_vm2, %v3942_v13  ;;  %v3935_v20 = vadd.f32 %v3933_v54, %v3929_v58 }
0x2045   :  { %4647 = vmatpush3.bf16.msra.mxu1 %v4701_v8  ;;  %4650 = vmatprep.mubr.msk.bf16.mxu1 %vm4847_vm3, %v4846_v42 }
0x2046   :  { %4648 = vmatprep.subr.bf16.mxu1 %v4846_v42  ;;  %3937 = vst.msk [vmem:[#allocation2 + $0x8] sm:$0xff] %vm146_vm2, %v3935_v20  ;;  %v4008_v7 = vpack.c.bf16 %v3935_v20, %v3935_v20 }
0x2049   :  { %4649 = vmatpush3.bf16.msra.mxu1 %v4702_v50 }
0x204c   :  { %4651 = vmatmul.mubr.msk.bf16.vlgmr.msra.gmra.mxu1 %vm146_vm2, %v4008_v7 }
0x204d   :  { %4811 = shalt.err (!%p4808_p4)
}
0x204e   :  { %s4861_s8 = smov 128   ;;  %s4862_s21 = smov 8   ;;  %v4799_v42 = vld [vmem:[%s5613_s4] sm:$0xf]  ;;  %vm4002_vm7 = vcmask 253952  }
0x204f   :  { %4077 = dma.vmem_to_hbm [thread:$0]  %s4072_s1, 256, %s5618_s9, [#allocation3], %s4861_s8, %s4861_s8, %s4862_s21   ;;  %v3956_v34 = vrot.slane %v4799_v42, 2 }
0x2050   :  { %s4863_s9 = smov [#allocation4]  }
0x2051   :  { %s4084_s2 = sshll.u32 %s4863_s9, 4  ;;  %s4085_s2 = int_to_ptr.vmem [resolvable:$true] %s4084_s2 }
0x2052   :  { %s4820_s4 = scalar_lea.vmem %s4085_s2, 32  ;;  %p4825_p6 = scmp.lt.s32.totalorder %s4085_s2, %s4085_s2 }
0x2053   :  { %p4821_p5 = scmp.ne.s32.totalorder %s4085_s2, %s4820_s4  ;;  %p4826_p7 = scmp.lt.s32.totalorder %s4820_s4, %s4820_s4 }
0x2055   :  { %p4827_p8 = por %p4826_p7, %p4825_p6 }
0x2057   :  { %p4828_p9 = pnand %p4827_p8, %p4821_p5 }
0x2104   :  { %v3995_v63 = vpop.f32.mrf.mxu1 }
0x2105   :  { %v3996_v59 = vadd.f32 %v3995_v63, %v3956_v34 }
0x2106   :  { %v4644_v60 = vpop.f32.mrf.mxu1 }
0x2107   :  { %4795 = vtanh.f32 %v3996_v59 }
0x2108   :  { %v3998_v61 = vpop.f32.mrf.mxu1 }
0x210a   :  { %v4645_v0 = vpop.f32.mrf.mxu1 }
0x210c   :  { %v4058_v2 = vpop.f32.mrf.mxu1 }
0x210d   :  { %v4059_v3 = vadd.f32 %v4058_v2, %v3956_v34 }
0x210e   :  { %v4652_v5 = vpop.f32.mrf.mxu1 }
0x210f   :  { %4797 = vtanh.f32 %v4059_v3 }
0x2110   :  { %v4061_v10 = vpop.f32.mrf.mxu1 }
0x2112   :  { %v4653_v11 = vpop.f32.mrf.mxu1 }
0x2114   :  { %v4796_v12 = vpop.eup %4795 }
0x2115   :  { %4003 = vst.msk [vmem:[#allocation4] sm:$0x1] %vm4002_vm7, %v4796_v12 }
0x211c   :  { %v4798_v14 = vpop.eup %4797 }
0x211d   :  { %4065 = vst.msk [vmem:[#allocation4 + $0x1] sm:$0x1] %vm4002_vm7, %v4798_v14 }
0x211e   :  { %4831 = shalt.err (!%p4828_p9)
}
0x211f   :  { %4087 = dma.vmem_to_hbm [thread:$0]  %s4085_s2, 32, %s5619_s10, [#allocation5]  }
0x2120   :  { %4840 = dma.done.wait [#allocation3], 256  }
0x2121   :  { %4841 = vsyncadd [#allocation3], 4294967040 }
0x2122   :  { %4842 = dma.done.wait [#allocation5], 32  }
0x2123   :  { %4843 = vsyncadd [#allocation5], 4294967264 }
0x2124   :  { %4094 = vsyncpa [#allocation3], 1 }
0x2125   :  { %4095 = vsyncpa [#allocation5], 1 }

</bundles_post_ra>
